<compile_context>
chip_gen: v7x
topology: tpu7x:2x2x1
jax: 0.10.0
libtpu: 0.0.40
codegen_flags: <defaults>
</compile_context>

<pallas_src>
import functools
import math

import jax
import jax.numpy as jnp
from jax.experimental import pallas as pl
from jax.experimental.pallas import tpu as pltpu


ACT_DTYPE = jnp.bfloat16   # activation / weight carry dtype (f32 accumulation inside)


# ----------------------------------------------------------------------------
# generation-aware tiling / VMEM helpers
# ----------------------------------------------------------------------------

def _detect_vmem_bytes():
    try:
        return int(pltpu.get_tpu_info().vmem_capacity_bytes)
    except Exception:
        pass
    try:
        kind = jax.devices()[0].device_kind.lower()
        if "v7" in kind:
            return 64 * 1024 * 1024
    except Exception:
        pass
    return 128 * 1024 * 1024


_VMEM_BYTES = _detect_vmem_bytes()
_SMALL_VMEM = _VMEM_BYTES <= 64 * 1024 * 1024          # v7x: 64 MiB per TensorCore
_SCOPED_VMEM_CAP = int(_VMEM_BYTES * 0.75)             # ~48 MiB v7x, ~96 MiB v5e/v6e
_DEF_TM = 256 if _SMALL_VMEM else 512
_DEF_TN = 256 if _SMALL_VMEM else 512
_DEF_TK = 512


def _tile(dim, target, align):
    """Largest multiple of `align` that divides `dim` and is <= target, else `dim`."""
    if dim <= target:
        return dim
    t = (target // align) * align
    while t >= align:
        if dim % t == 0:
            return t
        t -= align
    return dim


def _nbytes(shape, dtype=jnp.float32):
    return math.prod(shape) * jnp.dtype(dtype).itemsize


def _vmem_limit(*block_bytes):
    est = int(sum(block_bytes) * 2.5)          # ~2x double buffering + headroom
    return int(min(max(est, 32 * 1024 * 1024), _SCOPED_VMEM_CAP))


# ----------------------------------------------------------------------------
# Tiled linear kernel with fused epilogue (bias -> scale -> GELU -> residual)
# ----------------------------------------------------------------------------

def _linear_kernel(*refs, has_bias, has_residual, activation, scale):
    x_ref, w_ref = refs[0], refs[1]
    i = 2
    b_ref = r_ref = None
    if has_bias:
        b_ref = refs[i]; i += 1
    if has_residual:
        r_ref = refs[i]; i += 1
    o_ref, acc_ref = refs[i], refs[i + 1]

    k = pl.program_id(2)

    @pl.when(k == 0)
    def _():
        acc_ref[...] = jnp.zeros_like(acc_ref)

    # inputs are already bf16 (no in-kernel cast); f32 MXU accumulation
    acc_ref[...] += jnp.dot(x_ref[...], w_ref[...],
                            preferred_element_type=jnp.float32)

    @pl.when(k == pl.num_programs(2) - 1)
    def _():
        acc = acc_ref[...]
        if has_bias:
            acc = acc + b_ref[...]
        if scale != 1.0:                       # torch: (q_proj(x)) * scaling
            acc = acc * scale
        if activation == "gelu":
            # tanh-approx GELU (EUP tanh); Whisper default is erf-GELU (diff ~1e-3),
            # fused here to avoid a full extra HBM pass over the FFN activation.
            c = math.sqrt(2.0 / math.pi)
            acc = 0.5 * acc * (1.0 + jnp.tanh(c * (acc + 0.044715 * (acc * acc * acc))))
        if has_residual:
            acc = acc + r_ref[...].astype(jnp.float32)
        o_ref[...] = acc.astype(o_ref.dtype)


def pallas_linear(x, w, b=None, *, residual=None, activation=None, scale=1.0,
                  tm=None, tn=None, tk=None):
    """out = epilogue(x @ w); x:[M,K], w:[K,N] (= torch W.T, bf16), b:[N] or None.

    Epilogue fused on the final K step: +bias, *scale, GELU, +residual ([M,N])."""
    M, K = x.shape
    Kw, N = w.shape
    assert K == Kw
    tm = _tile(M, tm or _DEF_TM, 8)
    tn = _tile(N, tn or _DEF_TN, 128)
    tk = _tile(K, tk or _DEF_TK, 128)
    assert M % tm == 0 and N % tn == 0 and K % tk == 0

    has_bias = b is not None
    has_residual = residual is not None

    in_specs = [
        pl.BlockSpec((tm, tk), lambda i, j, k: (i, k)),
        pl.BlockSpec((tk, tn), lambda i, j, k: (k, j)),
    ]
    inputs = [x, w]
    if has_bias:
        in_specs.append(pl.BlockSpec((1, tn), lambda i, j, k: (0, j)))
        inputs.append(b.reshape(1, N).astype(jnp.float32))
    if has_residual:
        in_specs.append(pl.BlockSpec((tm, tn), lambda i, j, k: (i, j)))
        inputs.append(residual)

    kernel = functools.partial(_linear_kernel, has_bias=has_bias,
                               has_residual=has_residual, activation=activation,
                               scale=scale)
    bpe = jnp.dtype(x.dtype).itemsize
    vmem = _vmem_limit(_nbytes((tm, tk), x.dtype), _nbytes((tk, tn), w.dtype),
                       _nbytes((tm, tn), jnp.float32) +
                       _nbytes((tm, tn), x.dtype) * (1 + int(has_residual)))
    cost = pl.CostEstimate(
        flops=2 * M * N * K,
        transcendentals=(M * N if activation == "gelu" else 0),
        bytes_accessed=bpe * (M * K + K * N + M * N * (1 + int(has_residual))))

    return pl.pallas_call(
        kernel,
        out_shape=jax.ShapeDtypeStruct((M, N), x.dtype),
        grid=(M // tm, N // tn, K // tk),
        in_specs=in_specs,
        out_specs=pl.BlockSpec((tm, tn), lambda i, j, k: (i, j)),
        scratch_shapes=[pltpu.VMEM((tm, tn), jnp.float32)],
        compiler_params=pltpu.CompilerParams(
            dimension_semantics=("parallel", "parallel", "arbitrary"),
            vmem_limit_bytes=vmem),
        cost_estimate=cost,
    )(*inputs)


# ----------------------------------------------------------------------------
# Row-tiled LayerNorm (eps=1e-5, matches torch.nn.LayerNorm); f32 statistics
# ----------------------------------------------------------------------------

def _layernorm_kernel(x_ref, g_ref, b_ref, o_ref):
    x = x_ref[...].astype(jnp.float32)
    mu = jnp.mean(x, axis=-1, keepdims=True)
    xc = x - mu
    var = jnp.mean(xc * xc, axis=-1, keepdims=True)
    y = xc * jax.lax.rsqrt(var + 1e-5)
    o_ref[...] = (y * g_ref[...] + b_ref[...]).astype(o_ref.dtype)


def pallas_layernorm(x, gamma, beta, *, tm=1024):
    M, D = x.shape
    tm = _tile(M, tm, 8)
    g2 = gamma.reshape(1, D).astype(jnp.float32)
    b2 = beta.reshape(1, D).astype(jnp.float32)
    return pl.pallas_call(
        _layernorm_kernel,
        out_shape=jax.ShapeDtypeStruct((M, D), x.dtype),
        grid=(M // tm,),
        in_specs=[
            pl.BlockSpec((tm, D), lambda i: (i, 0)),
            pl.BlockSpec((1, D), lambda i: (0, 0)),
            pl.BlockSpec((1, D), lambda i: (0, 0)),
        ],
        out_specs=pl.BlockSpec((tm, D), lambda i: (i, 0)),
        compiler_params=pltpu.CompilerParams(
            dimension_semantics=("parallel",),
            vmem_limit_bytes=_vmem_limit(2 * _nbytes((tm, D), x.dtype),
                                         _nbytes((tm, D), jnp.float32))),
    )(x, g2, b2)


# ----------------------------------------------------------------------------
# Attention: [B, T, D] in / out (bf16), all heads per program, per-head stores,
# in-kernel padding mask from scalar-prefetched lengths
# ----------------------------------------------------------------------------

_MASK_NEG = -1e30   # safe only because scores stay f32 (preferred_element_type)


def _attention_kernel(len_ref, q_ref, k_ref, v_ref, o_ref, *, n_heads, masked):
    b = pl.program_id(0)
    D = q_ref.shape[2]
    T = k_ref.shape[1]
    hd = D // n_heads

    q = q_ref[0]            # [tq, D] bf16 (q already scaled by head_dim**-0.5)
    k = k_ref[0]            # [T, D]  bf16
    v = v_ref[0]            # [T, D]  bf16

    if masked:
        kpos = jax.lax.broadcasted_iota(jnp.int32, (1, T), 1)
        bias = jnp.where(kpos < len_ref[b], 0.0, _MASK_NEG)   # [1, T], broadcast rows

    # static unroll over heads; each head's output stored straight into its lane slice
    for h in range(n_heads):
        sl = slice(h * hd, (h + 1) * hd)
        s = jax.lax.dot_general(q[:, sl], k[:, sl], (((1,), (1,)), ((), ())),
                                preferred_element_type=jnp.float32)       # [tq, T] f32
        if masked:
            s = s + bias
        s = s - jnp.max(s, axis=-1, keepdims=True)
        p = jnp.exp(s)
        p = p * pl.reciprocal(jnp.sum(p, axis=-1, keepdims=True), approx=True)
        o_h = jax.lax.dot_general(p.astype(v.dtype), v[:, sl],
                                  (((1,), (0,)), ((), ())),
                                  preferred_element_type=jnp.float32)     # [tq, hd]
        o_ref[0, :, sl] = o_h.astype(o_ref.dtype)


def pallas_attention(q, k, v, lengths, *, n_heads, masked, tq=256):
    """q, k, v: [B, T, D] bf16 (q pre-scaled); lengths: [B] int32 valid-key lengths."""
    B, T, D = q.shape
    tq = _tile(T, tq, 8)
    kernel = functools.partial(_attention_kernel, n_heads=n_heads, masked=masked)
    vmem = _vmem_limit(2 * _nbytes((tq, D), q.dtype), 2 * _nbytes((T, D), k.dtype),
                       2 * _nbytes((tq, T), jnp.float32))
    # TODO(synk): for very long sequences on v7x (64 MiB VMEM) switch the KV axis to a
    # flash-style grid loop with online-softmax scratch instead of whole-T K/V blocks.
    return pl.pallas_call(
        kernel,
        out_shape=jax.ShapeDtypeStruct((B, T, D), q.dtype),
        grid_spec=pltpu.PrefetchScalarGridSpec(
            num_scalar_prefetch=1,
            grid=(B, T // tq),
            in_specs=[
                pl.BlockSpec((1, tq, D), lambda b, i, lens: (b, i, 0)),
                pl.BlockSpec((1, T, D), lambda b, i, lens: (b, 0, 0)),
                pl.BlockSpec((1, T, D), lambda b, i, lens: (b, 0, 0)),
            ],
            out_specs=pl.BlockSpec((1, tq, D), lambda b, i, lens: (b, i, 0)),
        ),
        compiler_params=pltpu.CompilerParams(
            dimension_semantics=("parallel", "parallel"),
            vmem_limit_bytes=vmem),
    )(lengths.astype(jnp.int32), q, k, v)


# ----------------------------------------------------------------------------
# Batched matmul for the CIF weights @ hidden contraction (tiled over M and T)
# ----------------------------------------------------------------------------

def _bmm_kernel(a_ref, b_ref, o_ref, acc_ref):
    kk = pl.program_id(2)

    @pl.when(kk == 0)
    def _():
        acc_ref[...] = jnp.zeros_like(acc_ref)

    acc_ref[...] += jnp.dot(a_ref[0], b_ref[0], preferred_element_type=jnp.float32)

    @pl.when(kk == pl.num_programs(2) - 1)
    def _():
        o_ref[0] = acc_ref[...].astype(o_ref.dtype)


def pallas_bmm(a, b, *, tm=256, tk=512):
    """a: [B, M, T] @ b: [B, T, N] -> [B, M, N] (bf16 feeds, f32 accumulation)."""
    B, M, T = a.shape
    Bb, Tb, N = b.shape
    assert B == Bb and T == Tb
    tm = _tile(M, tm, 8)
    tk = _tile(T, tk, 128)
    return pl.pallas_call(
        _bmm_kernel,
        out_shape=jax.ShapeDtypeStruct((B, M, N), b.dtype),
        grid=(B, M // tm, T // tk),
        in_specs=[
            pl.BlockSpec((1, tm, tk), lambda i, j, k: (i, j, k)),
            pl.BlockSpec((1, tk, N), lambda i, j, k: (i, k, 0)),
        ],
        out_specs=pl.BlockSpec((1, tm, N), lambda i, j, k: (i, j, 0)),
        scratch_shapes=[pltpu.VMEM((tm, N), jnp.float32)],
        compiler_params=pltpu.CompilerParams(
            dimension_semantics=("parallel", "parallel", "arbitrary"),
            vmem_limit_bytes=_vmem_limit(_nbytes((tm, tk), a.dtype),
                                         _nbytes((tk, N), b.dtype),
                                         2 * _nbytes((tm, N), jnp.float32))),
    )(a, b)


# ----------------------------------------------------------------------------
# Whisper encoder layer (pre-norm) built from the Pallas kernels above
# ----------------------------------------------------------------------------

def whisper_encoder_layer(x, p, lengths, n_heads, *, masked):
    B, T, D = x.shape
    hd = D // n_heads
    scaling = float(hd) ** -0.5
    x2 = x.reshape(B * T, D)

    # --- self-attention block ---
    h = pallas_layernorm(x2, p["ln1_g"], p["ln1_b"])
    q = pallas_linear(h, p["q_w"], p["q_b"], scale=scaling)     # torch: q_proj(x)*scaling
    k = pallas_linear(h, p["k_w"], None)                        # k_proj has no bias
    v = pallas_linear(h, p["v_w"], p["v_b"])
    attn = pallas_attention(q.reshape(B, T, D), k.reshape(B, T, D), v.reshape(B, T, D),
                            lengths, n_heads=n_heads, masked=masked)
    x2 = pallas_linear(attn.reshape(B * T, D), p["o_w"], p["o_b"], residual=x2)

    # --- MLP block (GELU fused into fc1, residual fused into fc2) ---
    h = pallas_layernorm(x2, p["ln2_g"], p["ln2_b"])
    h = pallas_linear(h, p["fc1_w"], p["fc1_b"], activation="gelu")
    x2 = pallas_linear(h, p["fc2_w"], p["fc2_b"], residual=x2)
    return x2.reshape(B, T, D)


# ----------------------------------------------------------------------------
# CIF weight construction (exact translation of forward_cif's scatter loop),
# running on-device with lax.fori_loop + a do-while, over a STATIC token bound.
# TODO(synk): the fully serial integrate-and-fire scatter has no clean Pallas kernel
# equivalent here; it stays as an on-device lax loop (jittable).  A Pallas version with
# per-batch SMEM state and per-frame VMEM column writes is the next step if this
# dominates wall clock for long T.
# ----------------------------------------------------------------------------

def cif_weights_jax(alphas, num_tokens, max_tok, threshold=1.0):
    """Returns weights [B, max_tok, T] (f32); rows >= num_tokens[b] stay zero."""
    B, T = alphas.shape
    alphas = alphas.astype(jnp.float32)
    num_tokens = num_tokens.astype(jnp.int32)

    def token_one_hot(token_index):
        rows = jax.lax.broadcasted_iota(jnp.int32, (B, max_tok), 1)
        return rows == token_index[:, None]                      # [B, max_tok] bool

    def inner_body(t, state):
        w_t, integrate, remainds, token_index, alpha, alpha_needed, ready = state
        integrate = jnp.where(ready, integrate - 1.0, integrate)
        alpha_integrated = jnp.where(ready, alpha_needed, alpha)
        oh = token_one_hot(token_index)
        col = w_t[t]                                             # [B, max_tok]
        col = jnp.where(oh, alpha_integrated[:, None], col)      # scatter_ (overwrite)
        w_t = w_t.at[t].set(col)
        remainds = alpha - alpha_integrated
        token_index = jnp.minimum(token_index + ready.astype(jnp.int32), num_tokens - 1)
        alpha = remainds
        alpha_needed = jnp.ones_like(alpha_needed)
        ready = integrate >= threshold
        return (w_t, integrate, remainds, token_index, alpha, alpha_needed, ready)

    def outer_body(t, carry):
        w_t, integrate, remainds, token_index = carry
        # scatter_add_ of the carried remainder into column t-1 (skipped at t == 0)
        oh = token_one_hot(token_index).astype(jnp.float32)
        prev = oh * jnp.where(t > 0, remainds, 0.0)[:, None]
        w_t = w_t.at[jnp.maximum(t - 1, 0)].add(prev)

        alpha = jax.lax.dynamic_index_in_dim(alphas, t, axis=1, keepdims=False)  # [B]
        alpha_needed = 1.0 - integrate
        integrate = integrate + alpha
        ready = integrate >= threshold
        state = (w_t, integrate, remainds, token_index, alpha, alpha_needed, ready)
        state = inner_body(t, state)                                  # do-while: body once
        state = jax.lax.while_loop(lambda s: jnp.any(s[6]),
                                   functools.partial(inner_body, t), state)
        return (state[0], state[1], state[2], state[3])

    init = (jnp.zeros((T, B, max_tok), jnp.float32),
            jnp.zeros((B,), jnp.float32),
            jnp.zeros((B,), jnp.float32),
            jnp.zeros((B,), jnp.int32))
    w_t, _, _, _ = jax.lax.fori_loop(0, T, outer_body, init)
    return jnp.transpose(w_t, (1, 2, 0))                              # [B, max_tok, T]


# ----------------------------------------------------------------------------
# Parameter initialization (deterministic, synthetic — no checkpoint loading).
# Weights stored bf16 ([K, N] = torch W.T); biases / LN affine stay f32.
# ----------------------------------------------------------------------------

def _linear_params(key, k_in, n_out, bias=True):
    kw, kb = jax.random.split(key)
    w = (jax.random.normal(kw, (k_in, n_out), jnp.float32) * 0.05).astype(ACT_DTYPE)
    b = jax.random.normal(kb, (n_out,), jnp.float32) * 0.01 if bias else None
    return w, b


def _encoder_layer_params(key, d_model, ffn_dim):
    ks = jax.random.split(key, 6)
    p = {}
    p["ln1_g"] = jnp.ones((d_model,), jnp.float32)
    p["ln1_b"] = jnp.zeros((d_model,), jnp.float32)
    p["q_w"], p["q_b"] = _linear_params(ks[0], d_model, d_model, bias=True)
    p["k_w"], _ = _linear_params(ks[1], d_model, d_model, bias=False)
    p["v_w"], p["v_b"] = _linear_params(ks[2], d_model, d_model, bias=True)
    p["o_w"], p["o_b"] = _linear_params(ks[3], d_model, d_model, bias=True)
    p["ln2_g"] = jnp.ones((d_model,), jnp.float32)
    p["ln2_b"] = jnp.zeros((d_model,), jnp.float32)
    p["fc1_w"], p["fc1_b"] = _linear_params(ks[4], d_model, ffn_dim)
    p["fc2_w"], p["fc2_b"] = _linear_params(ks[5], ffn_dim, d_model)
    return p


def init_cformer_params(key, d_model, ffn_dim, out_dim, vocab_size,
                        num_pre_cif_layers, num_post_cif_layers):
    n_keys = num_pre_cif_layers + num_post_cif_layers + 3
    ks = jax.random.split(key, n_keys)
    i = 0
    params = {"pre_cif_layers": [], "post_cif_layers": []}
    for _ in range(num_pre_cif_layers):
        params["pre_cif_layers"].append(_encoder_layer_params(ks[i], d_model, ffn_dim)); i += 1
    # cif_proj is Linear(D-1 -> D); we pad a zero K-row so the kernel contracts over a
    # lane-dense width-D input whose last (alpha) channel is zeroed — identical result.
    w_cif, b_cif = _linear_params(ks[i], d_model - 1, d_model); i += 1
    params["cif_proj_w"] = jnp.concatenate(
        [w_cif, jnp.zeros((1, d_model), ACT_DTYPE)], axis=0)
    params["cif_proj_b"] = b_cif
    for _ in range(num_post_cif_layers):
        params["post_cif_layers"].append(_encoder_layer_params(ks[i], d_model, ffn_dim)); i += 1
    params["tok_proj_w"], params["tok_proj_b"] = _linear_params(ks[i], d_model, out_dim); i += 1
    params["lm_head_w"], _ = _linear_params(ks[i], d_model, vocab_size, bias=False)
    return params


# ----------------------------------------------------------------------------
# CFormer forward — split into two jits so the post-CIF token axis can run at a
# bucketed static bound derived from the data-dependent num_tokens.
# ----------------------------------------------------------------------------

@functools.partial(jax.jit, static_argnames=("n_heads",))
def cformer_stage1(params, hidden_states, attention_mask, *, n_heads):
    """Pre-CIF encoder layers + alphas / num_tokens / resize (all at frame length T)."""
    B, T, D = hidden_states.shape
    x = hidden_states.astype(ACT_DTYPE)

    dummy_lens = jnp.full((B,), T, jnp.int32)      # attention_mask=None in the reference
    for lp in params["pre_cif_layers"]:
        x = whisper_encoder_layer(x, lp, dummy_lens, n_heads, masked=False)

    # get_alphas: sigmoid of the last feature channel, masked (f32 math)
    alphas = jax.nn.sigmoid(x[:, :, -1].astype(jnp.float32))
    alphas = alphas * attention_mask.astype(jnp.float32)

    # eval-mode num_tokens
    alphas_sum = jnp.sum(alphas, axis=-1)
    num_tokens = jnp.maximum(jnp.round(alphas_sum).astype(jnp.int32), 1)

    # resize: rescale alphas so each row sums to num_tokens (guarded divide)
    scale = num_tokens.astype(jnp.float32) / jnp.maximum(alphas_sum, 1e-6)
    scaled_alphas = alphas * scale[:, None]
    return x, scaled_alphas, alphas_sum, num_tokens


@functools.partial(jax.jit, static_argnames=("n_heads", "max_token_bound"))
def cformer_stage2(params, x, scaled_alphas, num_tokens, *, n_heads, max_token_bound):
    """CIF contraction + post-CIF stack + heads, at the (bucketed) static token bound."""
    B, T, D = x.shape
    MT = max_token_bound

    # CIF weights (on-device lax loop) and weights @ hidden bmm (Pallas).
    weights = cif_weights_jax(scaled_alphas, num_tokens, MT)            # [B, MT, T] f32

    # Lane-dense substitute for hidden[:, :, :-1]: zero the alpha channel, keep width D.
    x_feat = x.at[:, :, D - 1].set(jnp.zeros((), ACT_DTYPE))
    cif_hidden = pallas_bmm(weights.astype(ACT_DTYPE), x_feat)          # [B, MT, D]

    # length_to_attention_mask(num_tokens) at the static bound
    cif_attn_mask = (jnp.arange(MT)[None, :] < num_tokens[:, None]).astype(jnp.int32)

    # cif_proj: Linear(D-1 -> D) realized as a width-D contraction with a zero K-row.
    h = pallas_linear(cif_hidden.reshape(B * MT, D),
                      params["cif_proj_w"], params["cif_proj_b"]).reshape(B, MT, D)

    # post-CIF layers: key-padding mask built in-kernel from num_tokens
    for lp in params["post_cif_layers"]:
        h = whisper_encoder_layer(h, lp, num_tokens, n_heads, masked=True)

    h2 = h.reshape(B * MT, D)
    logits = pallas_linear(h2, params["lm_head_w"], None).reshape(B, MT, -1)
    out_h = pallas_linear(h2, params["tok_proj_w"], params["tok_proj_b"]).reshape(B, MT, -1)
    return out_h, cif_attn_mask, logits


def cformer_forward_trimmed(params, hidden_states, attention_mask, *, n_heads):
    """Matches the reference output shapes.  Only host readback: the [B] int32
    num_tokens, used both to pick the power-of-two token bucket (static for stage 2)
    and to trim the outputs to the dynamic max_tokens."""
    T = hidden_states.shape[1]
    x, scaled_alphas, alphas_sum, num_tokens = cformer_stage1(
        params, hidden_states, attention_mask, n_heads=n_heads)

    max_tok = int(jax.device_get(jnp.max(num_tokens)))
    bucket = max(8, 1 << max(0, max_tok - 1).bit_length())   # next power of two, >= 8
    bucket = min(bucket, max(8, T))                           # num_tokens <= T always

    out_h, cif_mask, logits = cformer_stage2(
        params, x, scaled_alphas, num_tokens,
        n_heads=n_heads, max_token_bound=bucket)
    return (out_h[:, :max_tok], cif_mask[:, :max_tok], logits[:, :max_tok],
            scaled_alphas, alphas_sum)


# ----------------------------------------------------------------------------

if __name__ == "__main__":
    B, T, D = 2, 16, 32          # batch, sequence, d_model
    N_HEADS = 8                  # num_hidden_heads
    FFN = 64                     # encoder_ffn_dim
    OUT_DIM = 24
    VOCAB = 50
    N_PRE, N_POST = 1, 1

    key = jax.random.PRNGKey(0)
    k_in, k_par = jax.random.split(key)
    hidden_states = jax.random.normal(k_in, (B, T, D), jnp.float32)
    attention_mask = jnp.stack([
        jnp.ones((T,), jnp.int32),
        (jnp.arange(T) < 12).astype(jnp.int32),   # second sequence has length 12
    ])

    params = init_cformer_params(k_par, D, FFN, OUT_DIM, VOCAB, N_PRE, N_POST)

    out_h, cif_mask, logits, alphas, alphas_sum = cformer_forward_trimmed(
        params, hidden_states, attention_mask, n_heads=N_HEADS)
    out_h, cif_mask, logits, alphas, alphas_sum = jax.block_until_ready(
        (out_h, cif_mask, logits, alphas, alphas_sum))

    assert out_h.shape[0] == B and out_h.shape[-1] == OUT_DIM
    assert logits.shape[-1] == VOCAB
    assert cif_mask.shape == (B, out_h.shape[1])
    assert alphas.shape == (B, T) and alphas_sum.shape == (B,)
    assert bool(jnp.all(jnp.isfinite(out_h.astype(jnp.float32))))
    assert bool(jnp.all(jnp.isfinite(logits.astype(jnp.float32))))
    print("KERNEL_OK")
</pallas_src>

<mosaic_0001>
module attributes {stable_mosaic.version = 11 : i64} {
  func.func @_linear_kernel(%arg0: i32, %arg1: i32, %arg2: i32, %arg3: memref<32x32xbf16, #tpu.memory_space<vmem>>, %arg4: memref<32x32xbf16, #tpu.memory_space<vmem>>, %arg5: memref<32x32xbf16, #tpu.memory_space<vmem>>, %arg6: memref<32x32xf32, #tpu.memory_space<vmem>>) attributes {dimension_semantics = [#tpu.dimension_semantics<parallel>, #tpu.dimension_semantics<parallel>, #tpu.dimension_semantics<arbitrary>], iteration_bounds = array<i64: 1, 1, 1>, scalar_prefetch = 0 : i64, scratch_operands = 1 : i64, tpu.core_type = #tpu.core_type<tc>, window_params = [{transform_indices = @transform_0, window_bounds = array<i64: 32, 32>}, {transform_indices = @transform_1, window_bounds = array<i64: 32, 32>}, {transform_indices = @transform_2, window_bounds = array<i64: 32, 32>}]} {
    %c0_i32 = arith.constant 0 : i32
    %0 = arith.cmpi eq, %arg2, %c0_i32 : i32
    %1 = arith.extui %0 : i1 to i32
    %c0_i32_0 = arith.constant 0 : i32
    %2 = arith.cmpi ne, %1, %c0_i32_0 : i32
    scf.if %2 {
      %cst_10 = arith.constant 0.000000e+00 : f32
      %12 = vector.broadcast %cst_10 : f32 to vector<32x32xf32>
      %c0_11 = arith.constant 0 : index
      %c0_12 = arith.constant 0 : index
      %13 = vector.load %arg6[%c0_11, %c0_12] : memref<32x32xf32, #tpu.memory_space<vmem>>, vector<32x32xf32>
      tpu.vector_store %arg6[%c0_11, %c0_12], %12 {strides = array<i32>} : memref<32x32xf32, #tpu.memory_space<vmem>>, vector<32x32xf32>,
    } else {
    }
    %c0 = arith.constant 0 : index
    %c0_1 = arith.constant 0 : index
    %3 = vector.load %arg6[%c0, %c0_1] : memref<32x32xf32, #tpu.memory_space<vmem>>, vector<32x32xf32>
    %c0_2 = arith.constant 0 : index
    %c0_3 = arith.constant 0 : index
    %4 = vector.load %arg3[%c0_2, %c0_3] : memref<32x32xbf16, #tpu.memory_space<vmem>>, vector<32x32xbf16>
    %c0_4 = arith.constant 0 : index
    %c0_5 = arith.constant 0 : index
    %5 = vector.load %arg4[%c0_4, %c0_5] : memref<32x32xbf16, #tpu.memory_space<vmem>>, vector<32x32xbf16>
    %cst = arith.constant dense<0.000000e+00> : vector<32x32xf32>
    %6 = tpu.matmul %4, %5, %cst {dimension_numbers = #tpu.dot_dimension_numbers<[1], [0], [0], [1], [0, 0, 1, 1], [], []>} : vector<32x32xbf16>, vector<32x32xbf16>, vector<32x32xf32> -> vector<32x32xf32>
    %7 = arith.addf %3, %6 : vector<32x32xf32>
    %c0_6 = arith.constant 0 : index
    %c0_7 = arith.constant 0 : index
    %8 = vector.load %arg6[%c0_6, %c0_7] : memref<32x32xf32, #tpu.memory_space<vmem>>, vector<32x32xf32>
    tpu.vector_store %arg6[%c0_6, %c0_7], %7 {strides = array<i32>} : memref<32x32xf32, #tpu.memory_space<vmem>>, vector<32x32xf32>,
    %c0_i32_8 = arith.constant 0 : i32
    %9 = arith.cmpi eq, %arg2, %c0_i32_8 : i32
    %10 = arith.extui %9 : i1 to i32
    %c0_i32_9 = arith.constant 0 : i32
    %11 = arith.cmpi ne, %10, %c0_i32_9 : i32
    scf.if %11 {
      %c0_10 = arith.constant 0 : index
      %c0_11 = arith.constant 0 : index
      %12 = vector.load %arg6[%c0_10, %c0_11] : memref<32x32xf32, #tpu.memory_space<vmem>>, vector<32x32xf32>
      %13 = arith.truncf %12 : vector<32x32xf32> to vector<32x32xbf16>
      %c0_12 = arith.constant 0 : index
      %c0_13 = arith.constant 0 : index
      %14 = vector.load %arg5[%c0_12, %c0_13] : memref<32x32xbf16, #tpu.memory_space<vmem>>, vector<32x32xbf16>
      tpu.vector_store %arg5[%c0_12, %c0_13], %13 {strides = array<i32>} : memref<32x32xbf16, #tpu.memory_space<vmem>>, vector<32x32xbf16>,
    } else {
    }
    return
  }
  func.func @transform_0(%arg0: i32, %arg1: i32, %arg2: i32) -> (i32, i32) {
    %c0_i32 = arith.constant 0 : i32
    return %arg0, %arg2 : i32, i32
  }
  func.func @transform_1(%arg0: i32, %arg1: i32, %arg2: i32) -> (i32, i32) {
    %c0_i32 = arith.constant 0 : i32
    return %arg2, %arg1 : i32, i32
  }
  func.func @transform_2(%arg0: i32, %arg1: i32, %arg2: i32) -> (i32, i32) {
    %c0_i32 = arith.constant 0 : i32
    return %arg0, %arg1 : i32, i32
  }
}

module attributes {stable_mosaic.version = 11 : i64} {
  func.func @_layernorm_kernel(%arg0: i32, %arg1: memref<32x32xbf16, #tpu.memory_space<vmem>>, %arg2: memref<1x32xf32, #tpu.memory_space<vmem>>, %arg3: memref<1x32xf32, #tpu.memory_space<vmem>>, %arg4: memref<32x32xbf16, #tpu.memory_space<vmem>>) attributes {dimension_semantics = [#tpu.dimension_semantics<parallel>], iteration_bounds = array<i64: 1>, scalar_prefetch = 0 : i64, scratch_operands = 0 : i64, tpu.core_type = #tpu.core_type<tc>, window_params = [{transform_indices = @transform_0, window_bounds = array<i64: 32, 32>}, {pipeline_mode = #tpu.pipeline_mode<synchronous>, transform_indices = @transform_1, window_bounds = array<i64: 1, 32>}, {pipeline_mode = #tpu.pipeline_mode<synchronous>, transform_indices = @transform_2, window_bounds = array<i64: 1, 32>}, {transform_indices = @transform_3, window_bounds = array<i64: 32, 32>}]} {
    %c0 = arith.constant 0 : index
    %c0_0 = arith.constant 0 : index
    %0 = vector.load %arg1[%c0, %c0_0] : memref<32x32xbf16, #tpu.memory_space<vmem>>, vector<32x32xbf16>
    %1 = arith.extf %0 : vector<32x32xbf16> to vector<32x32xf32>
    %cst = arith.constant dense<0.000000e+00> : vector<32xf32>
    %2 = vector.multi_reduction <add>, %1, %cst [1] : vector<32x32xf32> to vector<32xf32>
    %3 = vector.shape_cast %2 : vector<32xf32> to vector<32x1xf32>
    %cst_1 = arith.constant 3.200000e+01 : f32
    %4 = vector.broadcast %cst_1 : f32 to vector<32x1xf32>
    %5 = arith.divf %3, %4 : vector<32x1xf32>
    %6 = vector.broadcast %5 : vector<32x1xf32> to vector<32x32xf32>
    %7 = arith.subf %1, %6 : vector<32x32xf32>
    %8 = arith.mulf %7, %7 : vector<32x32xf32>
    %cst_2 = arith.constant dense<0.000000e+00> : vector<32xf32>
    %9 = vector.multi_reduction <add>, %8, %cst_2 [1] : vector<32x32xf32> to vector<32xf32>
    %10 = vector.shape_cast %9 : vector<32xf32> to vector<32x1xf32>
    %cst_3 = arith.constant 3.200000e+01 : f32
    %11 = vector.broadcast %cst_3 : f32 to vector<32x1xf32>
    %12 = arith.divf %10, %11 : vector<32x1xf32>
    %cst_4 = arith.constant 9.99999974E-6 : f32
    %13 = vector.broadcast %cst_4 : f32 to vector<32x1xf32>
    %14 = arith.addf %12, %13 : vector<32x1xf32>
    %15 = math.rsqrt %14 : vector<32x1xf32>
    %16 = vector.broadcast %15 : vector<32x1xf32> to vector<32x32xf32>
    %17 = arith.mulf %7, %16 : vector<32x32xf32>
    %c0_5 = arith.constant 0 : index
    %c0_6 = arith.constant 0 : index
    %18 = vector.load %arg2[%c0_5, %c0_6] : memref<1x32xf32, #tpu.memory_space<vmem>>, vector<1x32xf32>
    %19 = vector.broadcast %18 : vector<1x32xf32> to vector<32x32xf32>
    %20 = arith.mulf %17, %19 : vector<32x32xf32>
    %c0_7 = arith.constant 0 : index
    %c0_8 = arith.constant 0 : index
    %21 = vector.load %arg3[%c0_7, %c0_8] : memref<1x32xf32, #tpu.memory_space<vmem>>, vector<1x32xf32>
    %22 = vector.broadcast %21 : vector<1x32xf32> to vector<32x32xf32>
    %23 = arith.addf %20, %22 : vector<32x32xf32>
    %24 = arith.truncf %23 : vector<32x32xf32> to vector<32x32xbf16>
    %c0_9 = arith.constant 0 : index
    %c0_10 = arith.constant 0 : index
    %25 = vector.load %arg4[%c0_9, %c0_10] : memref<32x32xbf16, #tpu.memory_space<vmem>>, vector<32x32xbf16>
    tpu.vector_store %arg4[%c0_9, %c0_10], %24 {strides = array<i32>} : memref<32x32xbf16, #tpu.memory_space<vmem>>, vector<32x32xbf16>,
    return
  }
  func.func @transform_0(%arg0: i32) -> (i32, i32) {
    %c0_i32 = arith.constant 0 : i32
    %c0_i32_0 = arith.constant 0 : i32
    return %arg0, %c0_i32 : i32, i32
  }
  func.func @transform_1(%arg0: i32) -> (i32, i32) {
    %c0_i32 = arith.constant 0 : i32
    %c0_i32_0 = arith.constant 0 : i32
    %c0_i32_1 = arith.constant 0 : i32
    return %c0_i32, %c0_i32_0 : i32, i32
  }
  func.func @transform_2(%arg0: i32) -> (i32, i32) {
    %c0_i32 = arith.constant 0 : i32
    %c0_i32_0 = arith.constant 0 : i32
    %c0_i32_1 = arith.constant 0 : i32
    return %c0_i32, %c0_i32_0 : i32, i32
  }
  func.func @transform_3(%arg0: i32) -> (i32, i32) {
    %c0_i32 = arith.constant 0 : i32
    %c0_i32_0 = arith.constant 0 : i32
    return %arg0, %c0_i32 : i32, i32
  }
}

module attributes {stable_mosaic.version = 11 : i64} {
  func.func @_linear_kernel(%arg0: i32, %arg1: i32, %arg2: i32, %arg3: memref<32x32xbf16, #tpu.memory_space<vmem>>, %arg4: memref<32x32xbf16, #tpu.memory_space<vmem>>, %arg5: memref<1x32xf32, #tpu.memory_space<vmem>>, %arg6: memref<32x32xbf16, #tpu.memory_space<vmem>>, %arg7: memref<32x32xf32, #tpu.memory_space<vmem>>) attributes {dimension_semantics = [#tpu.dimension_semantics<parallel>, #tpu.dimension_semantics<parallel>, #tpu.dimension_semantics<arbitrary>], iteration_bounds = array<i64: 1, 1, 1>, scalar_prefetch = 0 : i64, scratch_operands = 1 : i64, tpu.core_type = #tpu.core_type<tc>, window_params = [{transform_indices = @transform_0, window_bounds = array<i64: 32, 32>}, {transform_indices = @transform_1, window_bounds = array<i64: 32, 32>}, {transform_indices = @transform_2, window_bounds = array<i64: 1, 32>}, {transform_indices = @transform_3, window_bounds = array<i64: 32, 32>}]} {
    %c0_i32 = arith.constant 0 : i32
    %0 = arith.cmpi eq, %arg2, %c0_i32 : i32
    %1 = arith.extui %0 : i1 to i32
    %c0_i32_0 = arith.constant 0 : i32
    %2 = arith.cmpi ne, %1, %c0_i32_0 : i32
    scf.if %2 {
      %cst_10 = arith.constant 0.000000e+00 : f32
      %12 = vector.broadcast %cst_10 : f32 to vector<32x32xf32>
      %c0_11 = arith.constant 0 : index
      %c0_12 = arith.constant 0 : index
      %13 = vector.load %arg7[%c0_11, %c0_12] : memref<32x32xf32, #tpu.memory_space<vmem>>, vector<32x32xf32>
      tpu.vector_store %arg7[%c0_11, %c0_12], %12 {strides = array<i32>} : memref<32x32xf32, #tpu.memory_space<vmem>>, vector<32x32xf32>,
    } else {
    }
    %c0 = arith.constant 0 : index
    %c0_1 = arith.constant 0 : index
    %3 = vector.load %arg7[%c0, %c0_1] : memref<32x32xf32, #tpu.memory_space<vmem>>, vector<32x32xf32>
    %c0_2 = arith.constant 0 : index
    %c0_3 = arith.constant 0 : index
    %4 = vector.load %arg3[%c0_2, %c0_3] : memref<32x32xbf16, #tpu.memory_space<vmem>>, vector<32x32xbf16>
    %c0_4 = arith.constant 0 : index
    %c0_5 = arith.constant 0 : index
    %5 = vector.load %arg4[%c0_4, %c0_5] : memref<32x32xbf16, #tpu.memory_space<vmem>>, vector<32x32xbf16>
    %cst = arith.constant dense<0.000000e+00> : vector<32x32xf32>
    %6 = tpu.matmul %4, %5, %cst {dimension_numbers = #tpu.dot_dimension_numbers<[1], [0], [0], [1], [0, 0, 1, 1], [], []>} : vector<32x32xbf16>, vector<32x32xbf16>, vector<32x32xf32> -> vector<32x32xf32>
    %7 = arith.addf %3, %6 : vector<32x32xf32>
    %c0_6 = arith.constant 0 : index
    %c0_7 = arith.constant 0 : index
    %8 = vector.load %arg7[%c0_6, %c0_7] : memref<32x32xf32, #tpu.memory_space<vmem>>, vector<32x32xf32>
    tpu.vector_store %arg7[%c0_6, %c0_7], %7 {strides = array<i32>} : memref<32x32xf32, #tpu.memory_space<vmem>>, vector<32x32xf32>,
    %c0_i32_8 = arith.constant 0 : i32
    %9 = arith.cmpi eq, %arg2, %c0_i32_8 : i32
    %10 = arith.extui %9 : i1 to i32
    %c0_i32_9 = arith.constant 0 : i32
    %11 = arith.cmpi ne, %10, %c0_i32_9 : i32
    scf.if %11 {
      %c0_10 = arith.constant 0 : index
      %c0_11 = arith.constant 0 : index
      %12 = vector.load %arg7[%c0_10, %c0_11] : memref<32x32xf32, #tpu.memory_space<vmem>>, vector<32x32xf32>
      %c0_12 = arith.constant 0 : index
      %c0_13 = arith.constant 0 : index
      %13 = vector.load %arg5[%c0_12, %c0_13] : memref<1x32xf32, #tpu.memory_space<vmem>>, vector<1x32xf32>
      %14 = vector.broadcast %13 : vector<1x32xf32> to vector<32x32xf32>
      %15 = arith.addf %12, %14 : vector<32x32xf32>
      %16 = arith.truncf %15 : vector<32x32xf32> to vector<32x32xbf16>
      %c0_14 = arith.constant 0 : index
      %c0_15 = arith.constant 0 : index
      %17 = vector.load %arg6[%c0_14, %c0_15] : memref<32x32xbf16, #tpu.memory_space<vmem>>, vector<32x32xbf16>
      tpu.vector_store %arg6[%c0_14, %c0_15], %16 {strides = array<i32>} : memref<32x32xbf16, #tpu.memory_space<vmem>>, vector<32x32xbf16>,
    } else {
    }
    return
  }
  func.func @transform_0(%arg0: i32, %arg1: i32, %arg2: i32) -> (i32, i32) {
    %c0_i32 = arith.constant 0 : i32
    return %arg0, %arg2 : i32, i32
  }
  func.func @transform_1(%arg0: i32, %arg1: i32, %arg2: i32) -> (i32, i32) {
    %c0_i32 = arith.constant 0 : i32
    return %arg2, %arg1 : i32, i32
  }
  func.func @transform_2(%arg0: i32, %arg1: i32, %arg2: i32) -> (i32, i32) {
    %c0_i32 = arith.constant 0 : i32
    %c0_i32_0 = arith.constant 0 : i32
    return %c0_i32, %arg1 : i32, i32
  }
  func.func @transform_3(%arg0: i32, %arg1: i32, %arg2: i32) -> (i32, i32) {
    %c0_i32 = arith.constant 0 : i32
    return %arg0, %arg1 : i32, i32
  }
}

module attributes {stable_mosaic.version = 11 : i64} {
  func.func @_linear_kernel(%arg0: i32, %arg1: i32, %arg2: i32, %arg3: memref<32x32xbf16, #tpu.memory_space<vmem>>, %arg4: memref<32x32xbf16, #tpu.memory_space<vmem>>, %arg5: memref<1x32xf32, #tpu.memory_space<vmem>>, %arg6: memref<32x32xbf16, #tpu.memory_space<vmem>>, %arg7: memref<32x32xf32, #tpu.memory_space<vmem>>) attributes {dimension_semantics = [#tpu.dimension_semantics<parallel>, #tpu.dimension_semantics<parallel>, #tpu.dimension_semantics<arbitrary>], iteration_bounds = array<i64: 1, 1, 1>, scalar_prefetch = 0 : i64, scratch_operands = 1 : i64, tpu.core_type = #tpu.core_type<tc>, window_params = [{transform_indices = @transform_0, window_bounds = array<i64: 32, 32>}, {transform_indices = @transform_1, window_bounds = array<i64: 32, 32>}, {transform_indices = @transform_2, window_bounds = array<i64: 1, 32>}, {transform_indices = @transform_3, window_bounds = array<i64: 32, 32>}]} {
    %c0_i32 = arith.constant 0 : i32
    %0 = arith.cmpi eq, %arg2, %c0_i32 : i32
    %1 = arith.extui %0 : i1 to i32
    %c0_i32_0 = arith.constant 0 : i32
    %2 = arith.cmpi ne, %1, %c0_i32_0 : i32
    scf.if %2 {
      %cst_10 = arith.constant 0.000000e+00 : f32
      %12 = vector.broadcast %cst_10 : f32 to vector<32x32xf32>
      %c0_11 = arith.constant 0 : index
      %c0_12 = arith.constant 0 : index
      %13 = vector.load %arg7[%c0_11, %c0_12] : memref<32x32xf32, #tpu.memory_space<vmem>>, vector<32x32xf32>
      tpu.vector_store %arg7[%c0_11, %c0_12], %12 {strides = array<i32>} : memref<32x32xf32, #tpu.memory_space<vmem>>, vector<32x32xf32>,
    } else {
    }
    %c0 = arith.constant 0 : index
    %c0_1 = arith.constant 0 : index
    %3 = vector.load %arg7[%c0, %c0_1] : memref<32x32xf32, #tpu.memory_space<vmem>>, vector<32x32xf32>
    %c0_2 = arith.constant 0 : index
    %c0_3 = arith.constant 0 : index
    %4 = vector.load %arg3[%c0_2, %c0_3] : memref<32x32xbf16, #tpu.memory_space<vmem>>, vector<32x32xbf16>
    %c0_4 = arith.constant 0 : index
    %c0_5 = arith.constant 0 : index
    %5 = vector.load %arg4[%c0_4, %c0_5] : memref<32x32xbf16, #tpu.memory_space<vmem>>, vector<32x32xbf16>
    %cst = arith.constant dense<0.000000e+00> : vector<32x32xf32>
    %6 = tpu.matmul %4, %5, %cst {dimension_numbers = #tpu.dot_dimension_numbers<[1], [0], [0], [1], [0, 0, 1, 1], [], []>} : vector<32x32xbf16>, vector<32x32xbf16>, vector<32x32xf32> -> vector<32x32xf32>
    %7 = arith.addf %3, %6 : vector<32x32xf32>
    %c0_6 = arith.constant 0 : index
    %c0_7 = arith.constant 0 : index
    %8 = vector.load %arg7[%c0_6, %c0_7] : memref<32x32xf32, #tpu.memory_space<vmem>>, vector<32x32xf32>
    tpu.vector_store %arg7[%c0_6, %c0_7], %7 {strides = array<i32>} : memref<32x32xf32, #tpu.memory_space<vmem>>, vector<32x32xf32>,
    %c0_i32_8 = arith.constant 0 : i32
    %9 = arith.cmpi eq, %arg2, %c0_i32_8 : i32
    %10 = arith.extui %9 : i1 to i32
    %c0_i32_9 = arith.constant 0 : i32
    %11 = arith.cmpi ne, %10, %c0_i32_9 : i32
    scf.if %11 {
      %c0_10 = arith.constant 0 : index
      %c0_11 = arith.constant 0 : index
      %12 = vector.load %arg7[%c0_10, %c0_11] : memref<32x32xf32, #tpu.memory_space<vmem>>, vector<32x32xf32>
      %c0_12 = arith.constant 0 : index
      %c0_13 = arith.constant 0 : index
      %13 = vector.load %arg5[%c0_12, %c0_13] : memref<1x32xf32, #tpu.memory_space<vmem>>, vector<1x32xf32>
      %14 = vector.broadcast %13 : vector<1x32xf32> to vector<32x32xf32>
      %15 = arith.addf %12, %14 : vector<32x32xf32>
      %cst_14 = arith.constant 5.000000e-01 : f32
      %16 = vector.broadcast %cst_14 : f32 to vector<32x32xf32>
      %17 = arith.mulf %15, %16 : vector<32x32xf32>
      %18 = arith.truncf %17 : vector<32x32xf32> to vector<32x32xbf16>
      %c0_15 = arith.constant 0 : index
      %c0_16 = arith.constant 0 : index
      %19 = vector.load %arg6[%c0_15, %c0_16] : memref<32x32xbf16, #tpu.memory_space<vmem>>, vector<32x32xbf16>
      tpu.vector_store %arg6[%c0_15, %c0_16], %18 {strides = array<i32>} : memref<32x32xbf16, #tpu.memory_space<vmem>>, vector<32x32xbf16>,
    } else {
    }
    return
  }
  func.func @transform_0(%arg0: i32, %arg1: i32, %arg2: i32) -> (i32, i32) {
    %c0_i32 = arith.constant 0 : i32
    return %arg0, %arg2 : i32, i32
  }
  func.func @transform_1(%arg0: i32, %arg1: i32, %arg2: i32) -> (i32, i32) {
    %c0_i32 = arith.constant 0 : i32
    return %arg2, %arg1 : i32, i32
  }
  func.func @transform_2(%arg0: i32, %arg1: i32, %arg2: i32) -> (i32, i32) {
    %c0_i32 = arith.constant 0 : i32
    %c0_i32_0 = arith.constant 0 : i32
    return %c0_i32, %arg1 : i32, i32
  }
  func.func @transform_3(%arg0: i32, %arg1: i32, %arg2: i32) -> (i32, i32) {
    %c0_i32 = arith.constant 0 : i32
    return %arg0, %arg1 : i32, i32
  }
}

module attributes {stable_mosaic.version = 11 : i64} {
  func.func @_linear_kernel(%arg0: i32, %arg1: i32, %arg2: i32, %arg3: memref<32x32xbf16, #tpu.memory_space<vmem>>, %arg4: memref<32x32xbf16, #tpu.memory_space<vmem>>, %arg5: memref<1x32xf32, #tpu.memory_space<vmem>>, %arg6: memref<32x32xbf16, #tpu.memory_space<vmem>>, %arg7: memref<32x32xbf16, #tpu.memory_space<vmem>>, %arg8: memref<32x32xf32, #tpu.memory_space<vmem>>) attributes {dimension_semantics = [#tpu.dimension_semantics<parallel>, #tpu.dimension_semantics<parallel>, #tpu.dimension_semantics<arbitrary>], iteration_bounds = array<i64: 1, 1, 1>, scalar_prefetch = 0 : i64, scratch_operands = 1 : i64, tpu.core_type = #tpu.core_type<tc>, window_params = [{transform_indices = @transform_0, window_bounds = array<i64: 32, 32>}, {transform_indices = @transform_1, window_bounds = array<i64: 32, 32>}, {transform_indices = @transform_2, window_bounds = array<i64: 1, 32>}, {transform_indices = @transform_3, window_bounds = array<i64: 32, 32>}, {transform_indices = @transform_4, window_bounds = array<i64: 32, 32>}]} {
    %c0_i32 = arith.constant 0 : i32
    %0 = arith.cmpi eq, %arg2, %c0_i32 : i32
    %1 = arith.extui %0 : i1 to i32
    %c0_i32_0 = arith.constant 0 : i32
    %2 = arith.cmpi ne, %1, %c0_i32_0 : i32
    scf.if %2 {
      %cst_10 = arith.constant 0.000000e+00 : f32
      %12 = vector.broadcast %cst_10 : f32 to vector<32x32xf32>
      %c0_11 = arith.constant 0 : index
      %c0_12 = arith.constant 0 : index
      %13 = vector.load %arg8[%c0_11, %c0_12] : memref<32x32xf32, #tpu.memory_space<vmem>>, vector<32x32xf32>
      tpu.vector_store %arg8[%c0_11, %c0_12], %12 {strides = array<i32>} : memref<32x32xf32, #tpu.memory_space<vmem>>, vector<32x32xf32>,
    } else {
    }
    %c0 = arith.constant 0 : index
    %c0_1 = arith.constant 0 : index
    %3 = vector.load %arg8[%c0, %c0_1] : memref<32x32xf32, #tpu.memory_space<vmem>>, vector<32x32xf32>
    %c0_2 = arith.constant 0 : index
    %c0_3 = arith.constant 0 : index
    %4 = vector.load %arg3[%c0_2, %c0_3] : memref<32x32xbf16, #tpu.memory_space<vmem>>, vector<32x32xbf16>
    %c0_4 = arith.constant 0 : index
    %c0_5 = arith.constant 0 : index
    %5 = vector.load %arg4[%c0_4, %c0_5] : memref<32x32xbf16, #tpu.memory_space<vmem>>, vector<32x32xbf16>
    %cst = arith.constant dense<0.000000e+00> : vector<32x32xf32>
    %6 = tpu.matmul %4, %5, %cst {dimension_numbers = #tpu.dot_dimension_numbers<[1], [0], [0], [1], [0, 0, 1, 1], [], []>} : vector<32x32xbf16>, vector<32x32xbf16>, vector<32x32xf32> -> vector<32x32xf32>
    %7 = arith.addf %3, %6 : vector<32x32xf32>
    %c0_6 = arith.constant 0 : index
    %c0_7 = arith.constant 0 : index
    %8 = vector.load %arg8[%c0_6, %c0_7] : memref<32x32xf32, #tpu.memory_space<vmem>>, vector<32x32xf32>
    tpu.vector_store %arg8[%c0_6, %c0_7], %7 {strides = array<i32>} : memref<32x32xf32, #tpu.memory_space<vmem>>, vector<32x32xf32>,
    %c0_i32_8 = arith.constant 0 : i32
    %9 = arith.cmpi eq, %arg2, %c0_i32_8 : i32
    %10 = arith.extui %9 : i1 to i32
    %c0_i32_9 = arith.constant 0 : i32
    %11 = arith.cmpi ne, %10, %c0_i32_9 : i32
    scf.if %11 {
      %c0_10 = arith.constant 0 : index
      %c0_11 = arith.constant 0 : index
      %12 = vector.load %arg8[%c0_10, %c0_11] : memref<32x32xf32, #tpu.memory_space<vmem>>, vector<32x32xf32>
      %c0_12 = arith.constant 0 : index
      %c0_13 = arith.constant 0 : index
      %13 = vector.load %arg5[%c0_12, %c0_13] : memref<1x32xf32, #tpu.memory_space<vmem>>, vector<1x32xf32>
      %14 = vector.broadcast %13 : vector<1x32xf32> to vector<32x32xf32>
      %15 = arith.addf %12, %14 : vector<32x32xf32>
      %c0_14 = arith.constant 0 : index
      %c0_15 = arith.constant 0 : index
      %16 = vector.load %arg6[%c0_14, %c0_15] : memref<32x32xbf16, #tpu.memory_space<vmem>>, vector<32x32xbf16>
      %17 = arith.extf %16 : vector<32x32xbf16> to vector<32x32xf32>
      %18 = arith.addf %15, %17 : vector<32x32xf32>
      %19 = arith.truncf %18 : vector<32x32xf32> to vector<32x32xbf16>
      %c0_16 = arith.constant 0 : index
      %c0_17 = arith.constant 0 : index
      %20 = vector.load %arg7[%c0_16, %c0_17] : memref<32x32xbf16, #tpu.memory_space<vmem>>, vector<32x32xbf16>
      tpu.vector_store %arg7[%c0_16, %c0_17], %19 {strides = array<i32>} : memref<32x32xbf16, #tpu.memory_space<vmem>>, vector<32x32xbf16>,
    } else {
    }
    return
  }
  func.func @transform_0(%arg0: i32, %arg1: i32, %arg2: i32) -> (i32, i32) {
    %c0_i32 = arith.constant 0 : i32
    return %arg0, %arg2 : i32, i32
  }
  func.func @transform_1(%arg0: i32, %arg1: i32, %arg2: i32) -> (i32, i32) {
    %c0_i32 = arith.constant 0 : i32
    return %arg2, %arg1 : i32, i32
  }
  func.func @transform_2(%arg0: i32, %arg1: i32, %arg2: i32) -> (i32, i32) {
    %c0_i32 = arith.constant 0 : i32
    %c0_i32_0 = arith.constant 0 : i32
    return %c0_i32, %arg1 : i32, i32
  }
  func.func @transform_3(%arg0: i32, %arg1: i32, %arg2: i32) -> (i32, i32) {
    %c0_i32 = arith.constant 0 : i32
    return %arg0, %arg1 : i32, i32
  }
  func.func @transform_4(%arg0: i32, %arg1: i32, %arg2: i32) -> (i32, i32) {
    %c0_i32 = arith.constant 0 : i32
    return %arg0, %arg1 : i32, i32
  }
}

module attributes {stable_mosaic.version = 11 : i64} {
  func.func @_attention_kernel(%arg0: i32, %arg1: i32, %arg2: memref<2xi32, #tpu.memory_space<smem>>, %arg3: memref<1x16x32xbf16, #tpu.memory_space<vmem>>, %arg4: memref<1x16x32xbf16, #tpu.memory_space<vmem>>, %arg5: memref<1x16x32xbf16, #tpu.memory_space<vmem>>, %arg6: memref<1x16x32xbf16, #tpu.memory_space<vmem>>) attributes {dimension_semantics = [#tpu.dimension_semantics<parallel>, #tpu.dimension_semantics<parallel>], iteration_bounds = array<i64: 2, 1>, scalar_prefetch = 1 : i64, scratch_operands = 0 : i64, tpu.core_type = #tpu.core_type<tc>, window_params = [{transform_indices = @transform_0, window_bounds = array<i64: 1, 16, 32>}, {transform_indices = @transform_1, window_bounds = array<i64: 1, 16, 32>}, {transform_indices = @transform_2, window_bounds = array<i64: 1, 16, 32>}, {transform_indices = @transform_3, window_bounds = array<i64: 1, 16, 32>}]} {
    %c0 = arith.constant 0 : index
    %c0_0 = arith.constant 0 : index
    %c0_1 = arith.constant 0 : index
    %0 = vector.load %arg3[%c0, %c0_0, %c0_1] : memref<1x16x32xbf16, #tpu.memory_space<vmem>>, vector<1x16x32xbf16>
    %1 = vector.shape_cast %0 : vector<1x16x32xbf16> to vector<16x32xbf16>
    %c0_2 = arith.constant 0 : index
    %c0_3 = arith.constant 0 : index
    %c0_4 = arith.constant 0 : index
    %2 = vector.load %arg4[%c0_2, %c0_3, %c0_4] : memref<1x16x32xbf16, #tpu.memory_space<vmem>>, vector<1x16x32xbf16>
    %3 = vector.shape_cast %2 : vector<1x16x32xbf16> to vector<16x32xbf16>
    %c0_5 = arith.constant 0 : index
    %c0_6 = arith.constant 0 : index
    %c0_7 = arith.constant 0 : index
    %4 = vector.load %arg5[%c0_5, %c0_6, %c0_7] : memref<1x16x32xbf16, #tpu.memory_space<vmem>>, vector<1x16x32xbf16>
    %5 = vector.shape_cast %4 : vector<1x16x32xbf16> to vector<16x32xbf16>
    %6 = vector.extract_strided_slice %1 {offsets = [0, 0], sizes = [16, 4], strides = [1, 1]} : vector<16x32xbf16> to vector<16x4xbf16>
    %7 = vector.extract_strided_slice %3 {offsets = [0, 0], sizes = [16, 4], strides = [1, 1]} : vector<16x32xbf16> to vector<16x4xbf16>
    %cst = arith.constant dense<0.000000e+00> : vector<16x16xf32>
    %8 = tpu.matmul %6, %7, %cst {dimension_numbers = #tpu.dot_dimension_numbers<[1], [1], [0], [0], [0, 0, 1, 0], [], []>} : vector<16x4xbf16>, vector<16x4xbf16>, vector<16x16xf32> -> vector<16x16xf32>
    %cst_8 = arith.constant dense<0xFF800000> : vector<16xf32>
    %9 = vector.multi_reduction <maximumf>, %8, %cst_8 [1] : vector<16x16xf32> to vector<16xf32>
    %10 = vector.shape_cast %9 : vector<16xf32> to vector<16x1xf32>
    %11 = vector.broadcast %10 : vector<16x1xf32> to vector<16x16xf32>
    %12 = arith.subf %8, %11 : vector<16x16xf32>
    %13 = math.exp %12 : vector<16x16xf32>
    %cst_9 = arith.constant dense<0.000000e+00> : vector<16xf32>
    %14 = vector.multi_reduction <add>, %13, %cst_9 [1] : vector<16x16xf32> to vector<16xf32>
    %15 = vector.shape_cast %14 : vector<16xf32> to vector<16x1xf32>
    %16 = tpu.reciprocal %15 {approx = true} : vector<16x1xf32> -> vector<16x1xf32>
    %17 = vector.broadcast %16 : vector<16x1xf32> to vector<16x16xf32>
    %18 = arith.mulf %13, %17 : vector<16x16xf32>
    %19 = arith.truncf %18 : vector<16x16xf32> to vector<16x16xbf16>
    %20 = vector.extract_strided_slice %5 {offsets = [0, 0], sizes = [16, 4], strides = [1, 1]} : vector<16x32xbf16> to vector<16x4xbf16>
    %cst_10 = arith.constant dense<0.000000e+00> : vector<16x4xf32>
    %21 = tpu.matmul %19, %20, %cst_10 {dimension_numbers = #tpu.dot_dimension_numbers<[1], [0], [0], [1], [0, 0, 1, 1], [], []>} : vector<16x16xbf16>, vector<16x4xbf16>, vector<16x4xf32> -> vector<16x4xf32>
    %22 = arith.truncf %21 : vector<16x4xf32> to vector<16x4xbf16>
    %c0_11 = arith.constant 0 : index
    %c0_12 = arith.constant 0 : index
    %c0_13 = arith.constant 0 : index
    %23 = vector.load %arg6[%c0_11, %c0_12, %c0_13] : memref<1x16x32xbf16, #tpu.memory_space<vmem>>, vector<1x16x4xbf16>
    %24 = vector.shape_cast %23 : vector<1x16x4xbf16> to vector<16x4xbf16>
    %25 = vector.shape_cast %22 : vector<16x4xbf16> to vector<1x16x4xbf16>
    tpu.vector_store %arg6[%c0_11, %c0_12, %c0_13], %25 {strides = array<i32>} : memref<1x16x32xbf16, #tpu.memory_space<vmem>>, vector<1x16x4xbf16>,
    %26 = vector.extract_strided_slice %1 {offsets = [0, 4], sizes = [16, 4], strides = [1, 1]} : vector<16x32xbf16> to vector<16x4xbf16>
    %27 = vector.extract_strided_slice %3 {offsets = [0, 4], sizes = [16, 4], strides = [1, 1]} : vector<16x32xbf16> to vector<16x4xbf16>
    %cst_14 = arith.constant dense<0.000000e+00> : vector<16x16xf32>
    %28 = tpu.matmul %26, %27, %cst_14 {dimension_numbers = #tpu.dot_dimension_numbers<[1], [1], [0], [0], [0, 0, 1, 0], [], []>} : vector<16x4xbf16>, vector<16x4xbf16>, vector<16x16xf32> -> vector<16x16xf32>
    %cst_15 = arith.constant dense<0xFF800000> : vector<16xf32>
    %29 = vector.multi_reduction <maximumf>, %28, %cst_15 [1] : vector<16x16xf32> to vector<16xf32>
    %30 = vector.shape_cast %29 : vector<16xf32> to vector<16x1xf32>
    %31 = vector.broadcast %30 : vector<16x1xf32> to vector<16x16xf32>
    %32 = arith.subf %28, %31 : vector<16x16xf32>
    %33 = math.exp %32 : vector<16x16xf32>
    %cst_16 = arith.constant dense<0.000000e+00> : vector<16xf32>
    %34 = vector.multi_reduction <add>, %33, %cst_16 [1] : vector<16x16xf32> to vector<16xf32>
    %35 = vector.shape_cast %34 : vector<16xf32> to vector<16x1xf32>
    %36 = tpu.reciprocal %35 {approx = true} : vector<16x1xf32> -> vector<16x1xf32>
    %37 = vector.broadcast %36 : vector<16x1xf32> to vector<16x16xf32>
    %38 = arith.mulf %33, %37 : vector<16x16xf32>
    %39 = arith.truncf %38 : vector<16x16xf32> to vector<16x16xbf16>
    %40 = vector.extract_strided_slice %5 {offsets = [0, 4], sizes = [16, 4], strides = [1, 1]} : vector<16x32xbf16> to vector<16x4xbf16>
    %cst_17 = arith.constant dense<0.000000e+00> : vector<16x4xf32>
    %41 = tpu.matmul %39, %40, %cst_17 {dimension_numbers = #tpu.dot_dimension_numbers<[1], [0], [0], [1], [0, 0, 1, 1], [], []>} : vector<16x16xbf16>, vector<16x4xbf16>, vector<16x4xf32> -> vector<16x4xf32>
    %42 = arith.truncf %41 : vector<16x4xf32> to vector<16x4xbf16>
    %c0_18 = arith.constant 0 : index
    %c0_19 = arith.constant 0 : index
    %c4 = arith.constant 4 : index
    %43 = vector.load %arg6[%c0_18, %c0_19, %c4] : memref<1x16x32xbf16, #tpu.memory_space<vmem>>, vector<1x16x4xbf16>
    %44 = vector.shape_cast %43 : vector<1x16x4xbf16> to vector<16x4xbf16>
    %45 = vector.shape_cast %42 : vector<16x4xbf16> to vector<1x16x4xbf16>
    tpu.vector_store %arg6[%c0_18, %c0_19, %c4], %45 {strides = array<i32>} : memref<1x16x32xbf16, #tpu.memory_space<vmem>>, vector<1x16x4xbf16>,
    %46 = vector.extract_strided_slice %1 {offsets = [0, 8], sizes = [16, 4], strides = [1, 1]} : vector<16x32xbf16> to vector<16x4xbf16>
    %47 = vector.extract_strided_slice %3 {offsets = [0, 8], sizes = [16, 4], strides = [1, 1]} : vector<16x32xbf16> to vector<16x4xbf16>
    %cst_20 = arith.constant dense<0.000000e+00> : vector<16x16xf32>
    %48 = tpu.matmul %46, %47, %cst_20 {dimension_numbers = #tpu.dot_dimension_numbers<[1], [1], [0], [0], [0, 0, 1, 0], [], []>} : vector<16x4xbf16>, vector<16x4xbf16>, vector<16x16xf32> -> vector<16x16xf32>
    %cst_21 = arith.constant dense<0xFF800000> : vector<16xf32>
    %49 = vector.multi_reduction <maximumf>, %48, %cst_21 [1] : vector<16x16xf32> to vector<16xf32>
    %50 = vector.shape_cast %49 : vector<16xf32> to vector<16x1xf32>
    %51 = vector.broadcast %50 : vector<16x1xf32> to vector<16x16xf32>
    %52 = arith.subf %48, %51 : vector<16x16xf32>
    %53 = math.exp %52 : vector<16x16xf32>
    %cst_22 = arith.constant dense<0.000000e+00> : vector<16xf32>
    %54 = vector.multi_reduction <add>, %53, %cst_22 [1] : vector<16x16xf32> to vector<16xf32>
    %55 = vector.shape_cast %54 : vector<16xf32> to vector<16x1xf32>
    %56 = tpu.reciprocal %55 {approx = true} : vector<16x1xf32> -> vector<16x1xf32>
    %57 = vector.broadcast %56 : vector<16x1xf32> to vector<16x16xf32>
    %58 = arith.mulf %53, %57 : vector<16x16xf32>
    %59 = arith.truncf %58 : vector<16x16xf32> to vector<16x16xbf16>
    %60 = vector.extract_strided_slice %5 {offsets = [0, 8], sizes = [16, 4], strides = [1, 1]} : vector<16x32xbf16> to vector<16x4xbf16>
    %cst_23 = arith.constant dense<0.000000e+00> : vector<16x4xf32>
    %61 = tpu.matmul %59, %60, %cst_23 {dimension_numbers = #tpu.dot_dimension_numbers<[1], [0], [0], [1], [0, 0, 1, 1], [], []>} : vector<16x16xbf16>, vector<16x4xbf16>, vector<16x4xf32> -> vector<16x4xf32>
    %62 = arith.truncf %61 : vector<16x4xf32> to vector<16x4xbf16>
    %c0_24 = arith.constant 0 : index
    %c0_25 = arith.constant 0 : index
    %c8 = arith.constant 8 : index
    %63 = vector.load %arg6[%c0_24, %c0_25, %c8] : memref<1x16x32xbf16, #tpu.memory_space<vmem>>, vector<1x16x4xbf16>
    %64 = vector.shape_cast %63 : vector<1x16x4xbf16> to vector<16x4xbf16>
    %65 = vector.shape_cast %62 : vector<16x4xbf16> to vector<1x16x4xbf16>
    tpu.vector_store %arg6[%c0_24, %c0_25, %c8], %65 {strides = array<i32>} : memref<1x16x32xbf16, #tpu.memory_space<vmem>>, vector<1x16x4xbf16>,
    %66 = vector.extract_strided_slice %1 {offsets = [0, 12], sizes = [16, 4], strides = [1, 1]} : vector<16x32xbf16> to vector<16x4xbf16>
    %67 = vector.extract_strided_slice %3 {offsets = [0, 12], sizes = [16, 4], strides = [1, 1]} : vector<16x32xbf16> to vector<16x4xbf16>
    %cst_26 = arith.constant dense<0.000000e+00> : vector<16x16xf32>
    %68 = tpu.matmul %66, %67, %cst_26 {dimension_numbers = #tpu.dot_dimension_numbers<[1], [1], [0], [0], [0, 0, 1, 0], [], []>} : vector<16x4xbf16>, vector<16x4xbf16>, vector<16x16xf32> -> vector<16x16xf32>
    %cst_27 = arith.constant dense<0xFF800000> : vector<16xf32>
    %69 = vector.multi_reduction <maximumf>, %68, %cst_27 [1] : vector<16x16xf32> to vector<16xf32>
    %70 = vector.shape_cast %69 : vector<16xf32> to vector<16x1xf32>
    %71 = vector.broadcast %70 : vector<16x1xf32> to vector<16x16xf32>
    %72 = arith.subf %68, %71 : vector<16x16xf32>
    %73 = math.exp %72 : vector<16x16xf32>
    %cst_28 = arith.constant dense<0.000000e+00> : vector<16xf32>
    %74 = vector.multi_reduction <add>, %73, %cst_28 [1] : vector<16x16xf32> to vector<16xf32>
    %75 = vector.shape_cast %74 : vector<16xf32> to vector<16x1xf32>
    %76 = tpu.reciprocal %75 {approx = true} : vector<16x1xf32> -> vector<16x1xf32>
    %77 = vector.broadcast %76 : vector<16x1xf32> to vector<16x16xf32>
    %78 = arith.mulf %73, %77 : vector<16x16xf32>
    %79 = arith.truncf %78 : vector<16x16xf32> to vector<16x16xbf16>
    %80 = vector.extract_strided_slice %5 {offsets = [0, 12], sizes = [16, 4], strides = [1, 1]} : vector<16x32xbf16> to vector<16x4xbf16>
    %cst_29 = arith.constant dense<0.000000e+00> : vector<16x4xf32>
    %81 = tpu.matmul %79, %80, %cst_29 {dimension_numbers = #tpu.dot_dimension_numbers<[1], [0], [0], [1], [0, 0, 1, 1], [], []>} : vector<16x16xbf16>, vector<16x4xbf16>, vector<16x4xf32> -> vector<16x4xf32>
    %82 = arith.truncf %81 : vector<16x4xf32> to vector<16x4xbf16>
    %c0_30 = arith.constant 0 : index
    %c0_31 = arith.constant 0 : index
    %c12 = arith.constant 12 : index
    %83 = vector.load %arg6[%c0_30, %c0_31, %c12] : memref<1x16x32xbf16, #tpu.memory_space<vmem>>, vector<1x16x4xbf16>
    %84 = vector.shape_cast %83 : vector<1x16x4xbf16> to vector<16x4xbf16>
    %85 = vector.shape_cast %82 : vector<16x4xbf16> to vector<1x16x4xbf16>
    tpu.vector_store %arg6[%c0_30, %c0_31, %c12], %85 {strides = array<i32>} : memref<1x16x32xbf16, #tpu.memory_space<vmem>>, vector<1x16x4xbf16>,
    %86 = vector.extract_strided_slice %1 {offsets = [0, 16], sizes = [16, 4], strides = [1, 1]} : vector<16x32xbf16> to vector<16x4xbf16>
    %87 = vector.extract_strided_slice %3 {offsets = [0, 16], sizes = [16, 4], strides = [1, 1]} : vector<16x32xbf16> to vector<16x4xbf16>
    %cst_32 = arith.constant dense<0.000000e+00> : vector<16x16xf32>
    %88 = tpu.matmul %86, %87, %cst_32 {dimension_numbers = #tpu.dot_dimension_numbers<[1], [1], [0], [0], [0, 0, 1, 0], [], []>} : vector<16x4xbf16>, vector<16x4xbf16>, vector<16x16xf32> -> vector<16x16xf32>
    %cst_33 = arith.constant dense<0xFF800000> : vector<16xf32>
    %89 = vector.multi_reduction <maximumf>, %88, %cst_33 [1] : vector<16x16xf32> to vector<16xf32>
    %90 = vector.shape_cast %89 : vector<16xf32> to vector<16x1xf32>
    %91 = vector.broadcast %90 : vector<16x1xf32> to vector<16x16xf32>
    %92 = arith.subf %88, %91 : vector<16x16xf32>
    %93 = math.exp %92 : vector<16x16xf32>
    %cst_34 = arith.constant dense<0.000000e+00> : vector<16xf32>
    %94 = vector.multi_reduction <add>, %93, %cst_34 [1] : vector<16x16xf32> to vector<16xf32>
    %95 = vector.shape_cast %94 : vector<16xf32> to vector<16x1xf32>
    %96 = tpu.reciprocal %95 {approx = true} : vector<16x1xf32> -> vector<16x1xf32>
    %97 = vector.broadcast %96 : vector<16x1xf32> to vector<16x16xf32>
    %98 = arith.mulf %93, %97 : vector<16x16xf32>
    %99 = arith.truncf %98 : vector<16x16xf32> to vector<16x16xbf16>
    %100 = vector.extract_strided_slice %5 {offsets = [0, 16], sizes = [16, 4], strides = [1, 1]} : vector<16x32xbf16> to vector<16x4xbf16>
    %cst_35 = arith.constant dense<0.000000e+00> : vector<16x4xf32>
    %101 = tpu.matmul %99, %100, %cst_35 {dimension_numbers = #tpu.dot_dimension_numbers<[1], [0], [0], [1], [0, 0, 1, 1], [], []>} : vector<16x16xbf16>, vector<16x4xbf16>, vector<16x4xf32> -> vector<16x4xf32>
    %102 = arith.truncf %101 : vector<16x4xf32> to vector<16x4xbf16>
    %c0_36 = arith.constant 0 : index
    %c0_37 = arith.constant 0 : index
    %c16 = arith.constant 16 : index
    %103 = vector.load %arg6[%c0_36, %c0_37, %c16] : memref<1x16x32xbf16, #tpu.memory_space<vmem>>, vector<1x16x4xbf16>
    %104 = vector.shape_cast %103 : vector<1x16x4xbf16> to vector<16x4xbf16>
    %105 = vector.shape_cast %102 : vector<16x4xbf16> to vector<1x16x4xbf16>
    tpu.vector_store %arg6[%c0_36, %c0_37, %c16], %105 {strides = array<i32>} : memref<1x16x32xbf16, #tpu.memory_space<vmem>>, vector<1x16x4xbf16>,
    %106 = vector.extract_strided_slice %1 {offsets = [0, 20], sizes = [16, 4], strides = [1, 1]} : vector<16x32xbf16> to vector<16x4xbf16>
    %107 = vector.extract_strided_slice %3 {offsets = [0, 20], sizes = [16, 4], strides = [1, 1]} : vector<16x32xbf16> to vector<16x4xbf16>
    %cst_38 = arith.constant dense<0.000000e+00> : vector<16x16xf32>
    %108 = tpu.matmul %106, %107, %cst_38 {dimension_numbers = #tpu.dot_dimension_numbers<[1], [1], [0], [0], [0, 0, 1, 0], [], []>} : vector<16x4xbf16>, vector<16x4xbf16>, vector<16x16xf32> -> vector<16x16xf32>
    %cst_39 = arith.constant dense<0xFF800000> : vector<16xf32>
    %109 = vector.multi_reduction <maximumf>, %108, %cst_39 [1] : vector<16x16xf32> to vector<16xf32>
    %110 = vector.shape_cast %109 : vector<16xf32> to vector<16x1xf32>
    %111 = vector.broadcast %110 : vector<16x1xf32> to vector<16x16xf32>
    %112 = arith.subf %108, %111 : vector<16x16xf32>
    %113 = math.exp %112 : vector<16x16xf32>
    %cst_40 = arith.constant dense<0.000000e+00> : vector<16xf32>
    %114 = vector.multi_reduction <add>, %113, %cst_40 [1] : vector<16x16xf32> to vector<16xf32>
    %115 = vector.shape_cast %114 : vector<16xf32> to vector<16x1xf32>
    %116 = tpu.reciprocal %115 {approx = true} : vector<16x1xf32> -> vector<16x1xf32>
    %117 = vector.broadcast %116 : vector<16x1xf32> to vector<16x16xf32>
    %118 = arith.mulf %113, %117 : vector<16x16xf32>
    %119 = arith.truncf %118 : vector<16x16xf32> to vector<16x16xbf16>
    %120 = vector.extract_strided_slice %5 {offsets = [0, 20], sizes = [16, 4], strides = [1, 1]} : vector<16x32xbf16> to vector<16x4xbf16>
    %cst_41 = arith.constant dense<0.000000e+00> : vector<16x4xf32>
    %121 = tpu.matmul %119, %120, %cst_41 {dimension_numbers = #tpu.dot_dimension_numbers<[1], [0], [0], [1], [0, 0, 1, 1], [], []>} : vector<16x16xbf16>, vector<16x4xbf16>, vector<16x4xf32> -> vector<16x4xf32>
    %122 = arith.truncf %121 : vector<16x4xf32> to vector<16x4xbf16>
    %c0_42 = arith.constant 0 : index
    %c0_43 = arith.constant 0 : index
    %c20 = arith.constant 20 : index
    %123 = vector.load %arg6[%c0_42, %c0_43, %c20] : memref<1x16x32xbf16, #tpu.memory_space<vmem>>, vector<1x16x4xbf16>
    %124 = vector.shape_cast %123 : vector<1x16x4xbf16> to vector<16x4xbf16>
    %125 = vector.shape_cast %122 : vector<16x4xbf16> to vector<1x16x4xbf16>
    tpu.vector_store %arg6[%c0_42, %c0_43, %c20], %125 {strides = array<i32>} : memref<1x16x32xbf16, #tpu.memory_space<vmem>>, vector<1x16x4xbf16>,
    %126 = vector.extract_strided_slice %1 {offsets = [0, 24], sizes = [16, 4], strides = [1, 1]} : vector<16x32xbf16> to vector<16x4xbf16>
    %127 = vector.extract_strided_slice %3 {offsets = [0, 24], sizes = [16, 4], strides = [1, 1]} : vector<16x32xbf16> to vector<16x4xbf16>
    %cst_44 = arith.constant dense<0.000000e+00> : vector<16x16xf32>
    %128 = tpu.matmul %126, %127, %cst_44 {dimension_numbers = #tpu.dot_dimension_numbers<[1], [1], [0], [0], [0, 0, 1, 0], [], []>} : vector<16x4xbf16>, vector<16x4xbf16>, vector<16x16xf32> -> vector<16x16xf32>
    %cst_45 = arith.constant dense<0xFF800000> : vector<16xf32>
    %129 = vector.multi_reduction <maximumf>, %128, %cst_45 [1] : vector<16x16xf32> to vector<16xf32>
    %130 = vector.shape_cast %129 : vector<16xf32> to vector<16x1xf32>
    %131 = vector.broadcast %130 : vector<16x1xf32> to vector<16x16xf32>
    %132 = arith.subf %128, %131 : vector<16x16xf32>
    %133 = math.exp %132 : vector<16x16xf32>
    %cst_46 = arith.constant dense<0.000000e+00> : vector<16xf32>
    %134 = vector.multi_reduction <add>, %133, %cst_46 [1] : vector<16x16xf32> to vector<16xf32>
    %135 = vector.shape_cast %134 : vector<16xf32> to vector<16x1xf32>
    %136 = tpu.reciprocal %135 {approx = true} : vector<16x1xf32> -> vector<16x1xf32>
    %137 = vector.broadcast %136 : vector<16x1xf32> to vector<16x16xf32>
    %138 = arith.mulf %133, %137 : vector<16x16xf32>
    %139 = arith.truncf %138 : vector<16x16xf32> to vector<16x16xbf16>
    %140 = vector.extract_strided_slice %5 {offsets = [0, 24], sizes = [16, 4], strides = [1, 1]} : vector<16x32xbf16> to vector<16x4xbf16>
    %cst_47 = arith.constant dense<0.000000e+00> : vector<16x4xf32>
    %141 = tpu.matmul %139, %140, %cst_47 {dimension_numbers = #tpu.dot_dimension_numbers<[1], [0], [0], [1], [0, 0, 1, 1], [], []>} : vector<16x16xbf16>, vector<16x4xbf16>, vector<16x4xf32> -> vector<16x4xf32>
    %142 = arith.truncf %141 : vector<16x4xf32> to vector<16x4xbf16>
    %c0_48 = arith.constant 0 : index
    %c0_49 = arith.constant 0 : index
    %c24 = arith.constant 24 : index
    %143 = vector.load %arg6[%c0_48, %c0_49, %c24] : memref<1x16x32xbf16, #tpu.memory_space<vmem>>, vector<1x16x4xbf16>
    %144 = vector.shape_cast %143 : vector<1x16x4xbf16> to vector<16x4xbf16>
    %145 = vector.shape_cast %142 : vector<16x4xbf16> to vector<1x16x4xbf16>
    tpu.vector_store %arg6[%c0_48, %c0_49, %c24], %145 {strides = array<i32>} : memref<1x16x32xbf16, #tpu.memory_space<vmem>>, vector<1x16x4xbf16>,
    %146 = vector.extract_strided_slice %1 {offsets = [0, 28], sizes = [16, 4], strides = [1, 1]} : vector<16x32xbf16> to vector<16x4xbf16>
    %147 = vector.extract_strided_slice %3 {offsets = [0, 28], sizes = [16, 4], strides = [1, 1]} : vector<16x32xbf16> to vector<16x4xbf16>
    %cst_50 = arith.constant dense<0.000000e+00> : vector<16x16xf32>
    %148 = tpu.matmul %146, %147, %cst_50 {dimension_numbers = #tpu.dot_dimension_numbers<[1], [1], [0], [0], [0, 0, 1, 0], [], []>} : vector<16x4xbf16>, vector<16x4xbf16>, vector<16x16xf32> -> vector<16x16xf32>
    %cst_51 = arith.constant dense<0xFF800000> : vector<16xf32>
    %149 = vector.multi_reduction <maximumf>, %148, %cst_51 [1] : vector<16x16xf32> to vector<16xf32>
    %150 = vector.shape_cast %149 : vector<16xf32> to vector<16x1xf32>
    %151 = vector.broadcast %150 : vector<16x1xf32> to vector<16x16xf32>
    %152 = arith.subf %148, %151 : vector<16x16xf32>
    %153 = math.exp %152 : vector<16x16xf32>
    %cst_52 = arith.constant dense<0.000000e+00> : vector<16xf32>
    %154 = vector.multi_reduction <add>, %153, %cst_52 [1] : vector<16x16xf32> to vector<16xf32>
    %155 = vector.shape_cast %154 : vector<16xf32> to vector<16x1xf32>
    %156 = tpu.reciprocal %155 {approx = true} : vector<16x1xf32> -> vector<16x1xf32>
    %157 = vector.broadcast %156 : vector<16x1xf32> to vector<16x16xf32>
    %158 = arith.mulf %153, %157 : vector<16x16xf32>
    %159 = arith.truncf %158 : vector<16x16xf32> to vector<16x16xbf16>
    %160 = vector.extract_strided_slice %5 {offsets = [0, 28], sizes = [16, 4], strides = [1, 1]} : vector<16x32xbf16> to vector<16x4xbf16>
    %cst_53 = arith.constant dense<0.000000e+00> : vector<16x4xf32>
    %161 = tpu.matmul %159, %160, %cst_53 {dimension_numbers = #tpu.dot_dimension_numbers<[1], [0], [0], [1], [0, 0, 1, 1], [], []>} : vector<16x16xbf16>, vector<16x4xbf16>, vector<16x4xf32> -> vector<16x4xf32>
    %162 = arith.truncf %161 : vector<16x4xf32> to vector<16x4xbf16>
    %c0_54 = arith.constant 0 : index
    %c0_55 = arith.constant 0 : index
    %c28 = arith.constant 28 : index
    %163 = vector.load %arg6[%c0_54, %c0_55, %c28] : memref<1x16x32xbf16, #tpu.memory_space<vmem>>, vector<1x16x4xbf16>
    %164 = vector.shape_cast %163 : vector<1x16x4xbf16> to vector<16x4xbf16>
    %165 = vector.shape_cast %162 : vector<16x4xbf16> to vector<1x16x4xbf16>
    tpu.vector_store %arg6[%c0_54, %c0_55, %c28], %165 {strides = array<i32>} : memref<1x16x32xbf16, #tpu.memory_space<vmem>>, vector<1x16x4xbf16>,
    return
  }
  func.func @transform_0(%arg0: i32, %arg1: i32, %arg2: memref<2xi32, #tpu.memory_space<smem>>) -> (i32, i32, i32) {
    %c0_i32 = arith.constant 0 : i32
    %c0_i32_0 = arith.constant 0 : i32
    return %arg0, %arg1, %c0_i32 : i32, i32, i32
  }
  func.func @transform_1(%arg0: i32, %arg1: i32, %arg2: memref<2xi32, #tpu.memory_space<smem>>) -> (i32, i32, i32) {
    %c0_i32 = arith.constant 0 : i32
    %c0_i32_0 = arith.constant 0 : i32
    %c0_i32_1 = arith.constant 0 : i32
    return %arg0, %c0_i32, %c0_i32_0 : i32, i32, i32
  }
  func.func @transform_2(%arg0: i32, %arg1: i32, %arg2: memref<2xi32, #tpu.memory_space<smem>>) -> (i32, i32, i32) {
    %c0_i32 = arith.constant 0 : i32
    %c0_i32_0 = arith.constant 0 : i32
    %c0_i32_1 = arith.constant 0 : i32
    return %arg0, %c0_i32, %c0_i32_0 : i32, i32, i32
  }
  func.func @transform_3(%arg0: i32, %arg1: i32, %arg2: memref<2xi32, #tpu.memory_space<smem>>) -> (i32, i32, i32) {
    %c0_i32 = arith.constant 0 : i32
    %c0_i32_0 = arith.constant 0 : i32
    return %arg0, %arg1, %c0_i32 : i32, i32, i32
  }
}

module attributes {stable_mosaic.version = 11 : i64} {
  func.func @_linear_kernel(%arg0: i32, %arg1: i32, %arg2: i32, %arg3: memref<32x32xbf16, #tpu.memory_space<vmem>>, %arg4: memref<32x64xbf16, #tpu.memory_space<vmem>>, %arg5: memref<1x64xf32, #tpu.memory_space<vmem>>, %arg6: memref<32x64xbf16, #tpu.memory_space<vmem>>, %arg7: memref<32x64xf32, #tpu.memory_space<vmem>>) attributes {dimension_semantics = [#tpu.dimension_semantics<parallel>, #tpu.dimension_semantics<parallel>, #tpu.dimension_semantics<arbitrary>], iteration_bounds = array<i64: 1, 1, 1>, scalar_prefetch = 0 : i64, scratch_operands = 1 : i64, tpu.core_type = #tpu.core_type<tc>, window_params = [{transform_indices = @transform_0, window_bounds = array<i64: 32, 32>}, {transform_indices = @transform_1, window_bounds = array<i64: 32, 64>}, {transform_indices = @transform_2, window_bounds = array<i64: 1, 64>}, {transform_indices = @transform_3, window_bounds = array<i64: 32, 64>}]} {
    %c0_i32 = arith.constant 0 : i32
    %0 = arith.cmpi eq, %arg2, %c0_i32 : i32
    %1 = arith.extui %0 : i1 to i32
    %c0_i32_0 = arith.constant 0 : i32
    %2 = arith.cmpi ne, %1, %c0_i32_0 : i32
    scf.if %2 {
      %cst_10 = arith.constant 0.000000e+00 : f32
      %12 = vector.broadcast %cst_10 : f32 to vector<32x64xf32>
      %c0_11 = arith.constant 0 : index
      %c0_12 = arith.constant 0 : index
      %13 = vector.load %arg7[%c0_11, %c0_12] : memref<32x64xf32, #tpu.memory_space<vmem>>, vector<32x64xf32>
      tpu.vector_store %arg7[%c0_11, %c0_12], %12 {strides = array<i32>} : memref<32x64xf32, #tpu.memory_space<vmem>>, vector<32x64xf32>,
    } else {
    }
    %c0 = arith.constant 0 : index
    %c0_1 = arith.constant 0 : index
    %3 = vector.load %arg7[%c0, %c0_1] : memref<32x64xf32, #tpu.memory_space<vmem>>, vector<32x64xf32>
    %c0_2 = arith.constant 0 : index
    %c0_3 = arith.constant 0 : index
    %4 = vector.load %arg3[%c0_2, %c0_3] : memref<32x32xbf16, #tpu.memory_space<vmem>>, vector<32x32xbf16>
    %c0_4 = arith.constant 0 : index
    %c0_5 = arith.constant 0 : index
    %5 = vector.load %arg4[%c0_4, %c0_5] : memref<32x64xbf16, #tpu.memory_space<vmem>>, vector<32x64xbf16>
    %cst = arith.constant dense<0.000000e+00> : vector<32x64xf32>
    %6 = tpu.matmul %4, %5, %cst {dimension_numbers = #tpu.dot_dimension_numbers<[1], [0], [0], [1], [0, 0, 1, 1], [], []>} : vector<32x32xbf16>, vector<32x64xbf16>, vector<32x64xf32> -> vector<32x64xf32>
    %7 = arith.addf %3, %6 : vector<32x64xf32>
    %c0_6 = arith.constant 0 : index
    %c0_7 = arith.constant 0 : index
    %8 = vector.load %arg7[%c0_6, %c0_7] : memref<32x64xf32, #tpu.memory_space<vmem>>, vector<32x64xf32>
    tpu.vector_store %arg7[%c0_6, %c0_7], %7 {strides = array<i32>} : memref<32x64xf32, #tpu.memory_space<vmem>>, vector<32x64xf32>,
    %c0_i32_8 = arith.constant 0 : i32
    %9 = arith.cmpi eq, %arg2, %c0_i32_8 : i32
    %10 = arith.extui %9 : i1 to i32
    %c0_i32_9 = arith.constant 0 : i32
    %11 = arith.cmpi ne, %10, %c0_i32_9 : i32
    scf.if %11 {
      %c0_10 = arith.constant 0 : index
      %c0_11 = arith.constant 0 : index
      %12 = vector.load %arg7[%c0_10, %c0_11] : memref<32x64xf32, #tpu.memory_space<vmem>>, vector<32x64xf32>
      %c0_12 = arith.constant 0 : index
      %c0_13 = arith.constant 0 : index
      %13 = vector.load %arg5[%c0_12, %c0_13] : memref<1x64xf32, #tpu.memory_space<vmem>>, vector<1x64xf32>
      %14 = vector.broadcast %13 : vector<1x64xf32> to vector<32x64xf32>
      %15 = arith.addf %12, %14 : vector<32x64xf32>
      %cst_14 = arith.constant 5.000000e-01 : f32
      %16 = vector.broadcast %cst_14 : f32 to vector<32x64xf32>
      %17 = arith.mulf %16, %15 : vector<32x64xf32>
      %18 = arith.mulf %15, %15 : vector<32x64xf32>
      %19 = arith.mulf %18, %15 : vector<32x64xf32>
      %cst_15 = arith.constant 4.471500e-02 : f32
      %20 = vector.broadcast %cst_15 : f32 to vector<32x64xf32>
      %21 = arith.mulf %20, %19 : vector<32x64xf32>
      %22 = arith.addf %15, %21 : vector<32x64xf32>
      %cst_16 = arith.constant 0.797884583 : f32
      %23 = vector.broadcast %cst_16 : f32 to vector<32x64xf32>
      %24 = arith.mulf %23, %22 : vector<32x64xf32>
      %25 = math.tanh %24 : vector<32x64xf32>
      %cst_17 = arith.constant 1.000000e+00 : f32
      %26 = vector.broadcast %cst_17 : f32 to vector<32x64xf32>
      %27 = arith.addf %26, %25 : vector<32x64xf32>
      %28 = arith.mulf %17, %27 : vector<32x64xf32>
      %29 = arith.truncf %28 : vector<32x64xf32> to vector<32x64xbf16>
      %c0_18 = arith.constant 0 : index
      %c0_19 = arith.constant 0 : index
      %30 = vector.load %arg6[%c0_18, %c0_19] : memref<32x64xbf16, #tpu.memory_space<vmem>>, vector<32x64xbf16>
      tpu.vector_store %arg6[%c0_18, %c0_19], %29 {strides = array<i32>} : memref<32x64xbf16, #tpu.memory_space<vmem>>, vector<32x64xbf16>,
    } else {
    }
    return
  }
  func.func @transform_0(%arg0: i32, %arg1: i32, %arg2: i32) -> (i32, i32) {
    %c0_i32 = arith.constant 0 : i32
    return %arg0, %arg2 : i32, i32
  }
  func.func @transform_1(%arg0: i32, %arg1: i32, %arg2: i32) -> (i32, i32) {
    %c0_i32 = arith.constant 0 : i32
    return %arg2, %arg1 : i32, i32
  }
  func.func @transform_2(%arg0: i32, %arg1: i32, %arg2: i32) -> (i32, i32) {
    %c0_i32 = arith.constant 0 : i32
    %c0_i32_0 = arith.constant 0 : i32
    return %c0_i32, %arg1 : i32, i32
  }
  func.func @transform_3(%arg0: i32, %arg1: i32, %arg2: i32) -> (i32, i32) {
    %c0_i32 = arith.constant 0 : i32
    return %arg0, %arg1 : i32, i32
  }
}

module attributes {stable_mosaic.version = 11 : i64} {
  func.func @_linear_kernel(%arg0: i32, %arg1: i32, %arg2: i32, %arg3: memref<32x64xbf16, #tpu.memory_space<vmem>>, %arg4: memref<64x32xbf16, #tpu.memory_space<vmem>>, %arg5: memref<1x32xf32, #tpu.memory_space<vmem>>, %arg6: memref<32x32xbf16, #tpu.memory_space<vmem>>, %arg7: memref<32x32xbf16, #tpu.memory_space<vmem>>, %arg8: memref<32x32xf32, #tpu.memory_space<vmem>>) attributes {dimension_semantics = [#tpu.dimension_semantics<parallel>, #tpu.dimension_semantics<parallel>, #tpu.dimension_semantics<arbitrary>], iteration_bounds = array<i64: 1, 1, 1>, scalar_prefetch = 0 : i64, scratch_operands = 1 : i64, tpu.core_type = #tpu.core_type<tc>, window_params = [{transform_indices = @transform_0, window_bounds = array<i64: 32, 64>}, {transform_indices = @transform_1, window_bounds = array<i64: 64, 32>}, {transform_indices = @transform_2, window_bounds = array<i64: 1, 32>}, {transform_indices = @transform_3, window_bounds = array<i64: 32, 32>}, {transform_indices = @transform_4, window_bounds = array<i64: 32, 32>}]} {
    %c0_i32 = arith.constant 0 : i32
    %0 = arith.cmpi eq, %arg2, %c0_i32 : i32
    %1 = arith.extui %0 : i1 to i32
    %c0_i32_0 = arith.constant 0 : i32
    %2 = arith.cmpi ne, %1, %c0_i32_0 : i32
    scf.if %2 {
      %cst_10 = arith.constant 0.000000e+00 : f32
      %12 = vector.broadcast %cst_10 : f32 to vector<32x32xf32>
      %c0_11 = arith.constant 0 : index
      %c0_12 = arith.constant 0 : index
      %13 = vector.load %arg8[%c0_11, %c0_12] : memref<32x32xf32, #tpu.memory_space<vmem>>, vector<32x32xf32>
      tpu.vector_store %arg8[%c0_11, %c0_12], %12 {strides = array<i32>} : memref<32x32xf32, #tpu.memory_space<vmem>>, vector<32x32xf32>,
    } else {
    }
    %c0 = arith.constant 0 : index
    %c0_1 = arith.constant 0 : index
    %3 = vector.load %arg8[%c0, %c0_1] : memref<32x32xf32, #tpu.memory_space<vmem>>, vector<32x32xf32>
    %c0_2 = arith.constant 0 : index
    %c0_3 = arith.constant 0 : index
    %4 = vector.load %arg3[%c0_2, %c0_3] : memref<32x64xbf16, #tpu.memory_space<vmem>>, vector<32x64xbf16>
    %c0_4 = arith.constant 0 : index
    %c0_5 = arith.constant 0 : index
    %5 = vector.load %arg4[%c0_4, %c0_5] : memref<64x32xbf16, #tpu.memory_space<vmem>>, vector<64x32xbf16>
    %cst = arith.constant dense<0.000000e+00> : vector<32x32xf32>
    %6 = tpu.matmul %4, %5, %cst {dimension_numbers = #tpu.dot_dimension_numbers<[1], [0], [0], [1], [0, 0, 1, 1], [], []>} : vector<32x64xbf16>, vector<64x32xbf16>, vector<32x32xf32> -> vector<32x32xf32>
    %7 = arith.addf %3, %6 : vector<32x32xf32>
    %c0_6 = arith.constant 0 : index
    %c0_7 = arith.constant 0 : index
    %8 = vector.load %arg8[%c0_6, %c0_7] : memref<32x32xf32, #tpu.memory_space<vmem>>, vector<32x32xf32>
    tpu.vector_store %arg8[%c0_6, %c0_7], %7 {strides = array<i32>} : memref<32x32xf32, #tpu.memory_space<vmem>>, vector<32x32xf32>,
    %c0_i32_8 = arith.constant 0 : i32
    %9 = arith.cmpi eq, %arg2, %c0_i32_8 : i32
    %10 = arith.extui %9 : i1 to i32
    %c0_i32_9 = arith.constant 0 : i32
    %11 = arith.cmpi ne, %10, %c0_i32_9 : i32
    scf.if %11 {
      %c0_10 = arith.constant 0 : index
      %c0_11 = arith.constant 0 : index
      %12 = vector.load %arg8[%c0_10, %c0_11] : memref<32x32xf32, #tpu.memory_space<vmem>>, vector<32x32xf32>
      %c0_12 = arith.constant 0 : index
      %c0_13 = arith.constant 0 : index
      %13 = vector.load %arg5[%c0_12, %c0_13] : memref<1x32xf32, #tpu.memory_space<vmem>>, vector<1x32xf32>
      %14 = vector.broadcast %13 : vector<1x32xf32> to vector<32x32xf32>
      %15 = arith.addf %12, %14 : vector<32x32xf32>
      %c0_14 = arith.constant 0 : index
      %c0_15 = arith.constant 0 : index
      %16 = vector.load %arg6[%c0_14, %c0_15] : memref<32x32xbf16, #tpu.memory_space<vmem>>, vector<32x32xbf16>
      %17 = arith.extf %16 : vector<32x32xbf16> to vector<32x32xf32>
      %18 = arith.addf %15, %17 : vector<32x32xf32>
      %19 = arith.truncf %18 : vector<32x32xf32> to vector<32x32xbf16>
      %c0_16 = arith.constant 0 : index
      %c0_17 = arith.constant 0 : index
      %20 = vector.load %arg7[%c0_16, %c0_17] : memref<32x32xbf16, #tpu.memory_space<vmem>>, vector<32x32xbf16>
      tpu.vector_store %arg7[%c0_16, %c0_17], %19 {strides = array<i32>} : memref<32x32xbf16, #tpu.memory_space<vmem>>, vector<32x32xbf16>,
    } else {
    }
    return
  }
  func.func @transform_0(%arg0: i32, %arg1: i32, %arg2: i32) -> (i32, i32) {
    %c0_i32 = arith.constant 0 : i32
    return %arg0, %arg2 : i32, i32
  }
  func.func @transform_1(%arg0: i32, %arg1: i32, %arg2: i32) -> (i32, i32) {
    %c0_i32 = arith.constant 0 : i32
    return %arg2, %arg1 : i32, i32
  }
  func.func @transform_2(%arg0: i32, %arg1: i32, %arg2: i32) -> (i32, i32) {
    %c0_i32 = arith.constant 0 : i32
    %c0_i32_0 = arith.constant 0 : i32
    return %c0_i32, %arg1 : i32, i32
  }
  func.func @transform_3(%arg0: i32, %arg1: i32, %arg2: i32) -> (i32, i32) {
    %c0_i32 = arith.constant 0 : i32
    return %arg0, %arg1 : i32, i32
  }
  func.func @transform_4(%arg0: i32, %arg1: i32, %arg2: i32) -> (i32, i32) {
    %c0_i32 = arith.constant 0 : i32
    return %arg0, %arg1 : i32, i32
  }
}

</mosaic_0001>

<bundles_post_ra>
// kernel: cformer_stage1.12
= control target key start
LH: loop header
LB: loop body
LE: loop exit
PB: predicated region body
PF: predicated region fallthrough
CT: control target
= control target key end

     0   :  { %vm19_vm0 = vcmask 261120   ;;  %v197_v1 = vmov 0.0   ;;  %vm156_vm1 = vcmask 257024   ;;  %s255_s1 = inlined_call_operand.vmem [shape: bf16[32,32], index: 1, kind: input, shape index: {}]   ;;  %s256_s0 = inlined_call_operand.vmem [shape: bf16[32,32], index: 0, kind: input, shape index: {}]   ;;  %s257_s2 = inlined_call_operand.vmem [shape: f32[1,32], index: 2, kind: input, shape index: {}]   ;;  %s258_s3 = inlined_call_operand.vmem [shape: bf16[32,32], index: 3, kind: output, shape index: {}]  }
   0x1   :  { %v193_v0 = vld [vmem:[%s255_s1] sm:$0xff]   ;;  %22 = vst.msk [vmem:[#allocation2 + $0x10] sm:$0xff] %vm19_vm0, %v197_v1  ;;  %20 = vst.msk [vmem:[#allocation2] sm:$0xff] %vm19_vm0, %v197_v1  ;;  %v194_v2 = vld [vmem:[%s255_s1 + $0x8] sm:$0xff]  }
   0x2   :  { %21 = vst.msk [vmem:[#allocation2 + $0x8] sm:$0xff] %vm19_vm0, %v197_v1  ;;  %23 = vst.msk [vmem:[#allocation2 + $0x18] sm:$0xff] %vm19_vm0, %v197_v1  ;;  %184 = vmatprep.subr.bf16.mxu0 %v193_v0  ;;  %v195_v3 = vld [vmem:[%s256_s0] sm:$0xff]   ;;  %v196_v4 = vld [vmem:[%s256_s0 + $0x8] sm:$0xff]  }
   0x3   :  { %185 = vmatpush3.bf16.msra.mxu0 %v193_v0  ;;  %188 = vmatprep.mubr.msk.bf16.mxu0 %vm19_vm0, %v195_v3  ;;  %v171_v17 = vld [vmem:[%s257_s2] ss:$0 sm:$0xff] }
   0x4   :  { %186 = vmatprep.subr.bf16.mxu0 %v194_v2 }
   0x7   :  { %187 = vmatpush3.bf16.msra.mxu0 %v194_v2 }
   0x8   :  { %v26_v5 = vld [vmem:[#allocation2 + $0x10] sm:$0xff]  ;;  %v24_v6 = vld [vmem:[#allocation2] sm:$0xff] }
   0x9   :  { %v27_v8 = vld [vmem:[#allocation2 + $0x18] sm:$0xff]  ;;  %v25_v11 = vld [vmem:[#allocation2 + $0x8] sm:$0xff] }
   0xa   :  { %189 = vmatmul.mubr.msk.bf16.vlgmr.msra.gmra.mrb[0].mxu0 %vm19_vm0, %v196_v4 }
  0xdd   :  { %v190_v7 = vpop.f32.mrb[0].mxu0 }
  0xde   :  { %v116_v9 = vadd.f32 %v190_v7, %v26_v5  ;;  %v99_v10 = vpop.f32.mrb[1].mxu0 }
  0xdf   :  { %v114_v12 = vadd.f32 %v99_v10, %v24_v6  ;;  %v191_v13 = vpop.f32.mrb[2].mxu0 }
  0xe0   :  { %120 = vst.msk [vmem:[#allocation2 + $0x10] sm:$0xff] %vm19_vm0, %v116_v9  ;;  %v117_v14 = vadd.f32 %v191_v13, %v27_v8  ;;  %v102_v15 = vpop.f32.mrb[3].mxu0 }
  0xe1   :  { %118 = vst.msk [vmem:[#allocation2] sm:$0xff] %vm19_vm0, %v114_v12  ;;  %v115_v16 = vadd.f32 %v102_v15, %v25_v11 }
  0xe2   :  { %121 = vst.msk [vmem:[#allocation2 + $0x18] sm:$0xff] %vm19_vm0, %v117_v14 }
  0xe3   :  { %119 = vst.msk [vmem:[#allocation2 + $0x8] sm:$0xff] %vm19_vm0, %v115_v16 }
  0xe7   :  { %v127_v18 = vld [vmem:[#allocation2 + $0x10] sm:$0xff] }
  0xe8   :  { %v138_v19 = vadd.f32 %v171_v17, %v127_v18  ;;  %v125_v20 = vld [vmem:[#allocation2] sm:$0xff] }
  0xe9   :  { %v136_v21 = vadd.f32 %v171_v17, %v125_v20  ;;  %v128_v22 = vld [vmem:[#allocation2 + $0x18] sm:$0xff] }
  0xea   :  { %v178_v23 = vpack.c.bf16 %v138_v19, %v138_v19  ;;  %v139_v24 = vadd.f32 %v171_v17, %v128_v22  ;;  %v126_v25 = vld [vmem:[#allocation2 + $0x8] sm:$0xff] }
  0xeb   :  { %v176_v26 = vpack.c.bf16 %v136_v21, %v136_v21  ;;  %v137_v27 = vadd.f32 %v171_v17, %v126_v25 }
  0xec   :  { %159 = vst.msk [vmem:[%s258_s3 + $0x8] sm:$0xf] %vm156_vm1, %v178_v23  ;;  %v179_v28 = vpack.c.bf16 %v139_v24, %v139_v24 }
  0xed   :  { %157 = vst.msk [vmem:[%s258_s3] sm:$0xf] %vm156_vm1, %v176_v26  ;;  %v177_v29 = vpack.c.bf16 %v137_v27, %v137_v27 }
  0xee   :  { %160 = vst.msk [vmem:[%s258_s3 + $0xc] sm:$0xf] %vm156_vm1, %v179_v28 }
  0xef   :  { %158 = vst.msk [vmem:[%s258_s3 + $0x4] sm:$0xf] %vm156_vm1, %v177_v29 }

// kernel: cformer_stage1.11
= control target key start
LH: loop header
LB: loop body
LE: loop exit
PB: predicated region body
PF: predicated region fallthrough
CT: control target
= control target key end

     0   :  { %vm16_vm0 = vcmask 261120   ;;  %v182_v1 = vmov 0.0   ;;  %vm142_vm1 = vcmask 257024   ;;  %s232_s1 = inlined_call_operand.vmem [shape: bf16[32,32], index: 1, kind: input, shape index: {}]   ;;  %s233_s0 = inlined_call_operand.vmem [shape: bf16[32,32], index: 0, kind: input, shape index: {}]   ;;  %s234_s2 = inlined_call_operand.vmem [shape: bf16[32,32], index: 2, kind: output, shape index: {}]  }
   0x1   :  { %v178_v0 = vld [vmem:[%s232_s1] sm:$0xff]   ;;  %19 = vst.msk [vmem:[#allocation2 + $0x10] sm:$0xff] %vm16_vm0, %v182_v1  ;;  %17 = vst.msk [vmem:[#allocation2] sm:$0xff] %vm16_vm0, %v182_v1  ;;  %v179_v2 = vld [vmem:[%s232_s1 + $0x8] sm:$0xff]  }
   0x2   :  { %18 = vst.msk [vmem:[#allocation2 + $0x8] sm:$0xff] %vm16_vm0, %v182_v1  ;;  %20 = vst.msk [vmem:[#allocation2 + $0x18] sm:$0xff] %vm16_vm0, %v182_v1  ;;  %169 = vmatprep.subr.bf16.mxu0 %v178_v0  ;;  %v180_v3 = vld [vmem:[%s233_s0] sm:$0xff]   ;;  %v181_v4 = vld [vmem:[%s233_s0 + $0x8] sm:$0xff]  }
   0x3   :  { %170 = vmatpush3.bf16.msra.mxu0 %v178_v0  ;;  %173 = vmatprep.mubr.msk.bf16.mxu0 %vm16_vm0, %v180_v3 }
   0x4   :  { %171 = vmatprep.subr.bf16.mxu0 %v179_v2 }
   0x7   :  { %172 = vmatpush3.bf16.msra.mxu0 %v179_v2 }
   0x8   :  { %v23_v5 = vld [vmem:[#allocation2 + $0x10] sm:$0xff]  ;;  %v21_v6 = vld [vmem:[#allocation2] sm:$0xff] }
   0x9   :  { %v24_v8 = vld [vmem:[#allocation2 + $0x18] sm:$0xff]  ;;  %v22_v11 = vld [vmem:[#allocation2 + $0x8] sm:$0xff] }
   0xa   :  { %174 = vmatmul.mubr.msk.bf16.vlgmr.msra.gmra.mrb[0].mxu0 %vm16_vm0, %v181_v4 }
  0xdd   :  { %v175_v7 = vpop.f32.mrb[0].mxu0 }
  0xde   :  { %v113_v9 = vadd.f32 %v175_v7, %v23_v5  ;;  %v96_v10 = vpop.f32.mrb[1].mxu0 }
  0xdf   :  { %v111_v12 = vadd.f32 %v96_v10, %v21_v6  ;;  %v176_v13 = vpop.f32.mrb[2].mxu0 }
  0xe0   :  { %117 = vst.msk [vmem:[#allocation2 + $0x10] sm:$0xff] %vm16_vm0, %v113_v9  ;;  %v114_v14 = vadd.f32 %v176_v13, %v24_v8  ;;  %v99_v15 = vpop.f32.mrb[3].mxu0 }
  0xe1   :  { %115 = vst.msk [vmem:[#allocation2] sm:$0xff] %vm16_vm0, %v111_v12  ;;  %v112_v16 = vadd.f32 %v99_v15, %v22_v11 }
  0xe2   :  { %118 = vst.msk [vmem:[#allocation2 + $0x18] sm:$0xff] %vm16_vm0, %v114_v14 }
  0xe3   :  { %116 = vst.msk [vmem:[#allocation2 + $0x8] sm:$0xff] %vm16_vm0, %v112_v16 }
  0xe7   :  { %v124_v17 = vld [vmem:[#allocation2 + $0x10] sm:$0xff] }
  0xe8   :  { %v163_v18 = vpack.c.bf16 %v124_v17, %v124_v17  ;;  %v122_v19 = vld [vmem:[#allocation2] sm:$0xff] }
  0xe9   :  { %v161_v20 = vpack.c.bf16 %v122_v19, %v122_v19  ;;  %v125_v21 = vld [vmem:[#allocation2 + $0x18] sm:$0xff] }
  0xea   :  { %145 = vst.msk [vmem:[%s234_s2 + $0x8] sm:$0xf] %vm142_vm1, %v163_v18  ;;  %v164_v22 = vpack.c.bf16 %v125_v21, %v125_v21  ;;  %v123_v23 = vld [vmem:[#allocation2 + $0x8] sm:$0xff] }
  0xeb   :  { %143 = vst.msk [vmem:[%s234_s2] sm:$0xf] %vm142_vm1, %v161_v20  ;;  %v162_v24 = vpack.c.bf16 %v123_v23, %v123_v23 }
  0xec   :  { %146 = vst.msk [vmem:[%s234_s2 + $0xc] sm:$0xf] %vm142_vm1, %v164_v22 }
  0xed   :  { %144 = vst.msk [vmem:[%s234_s2 + $0x4] sm:$0xf] %vm142_vm1, %v162_v24 }

// kernel: cformer_stage1.9
= control target key start
LH: loop header
LB: loop body
LE: loop exit
PB: predicated region body
PF: predicated region fallthrough
CT: control target
= control target key end

     0   :  { %vm22_vm0 = vcmask 261120   ;;  %vm114_vm1 = vcmask 257024   ;;  %s206_s0 = inlined_call_operand.vmem [shape: bf16[32,32], index: 0, kind: input, shape index: {}]   ;;  %s207_s1 = inlined_call_operand.vmem [shape: f32[1,32], index: 1, kind: input, shape index: {}]   ;;  %s208_s2 = inlined_call_operand.vmem [shape: f32[1,32], index: 2, kind: input, shape index: {}]   ;;  %s209_s3 = inlined_call_operand.vmem [shape: bf16[32,32], index: 3, kind: output, shape index: {}]  }
   0x1   :  { %v134_v0 = vld [vmem:[%s206_s0] sm:$0xff]   ;;  %v141_v1 = vld [vmem:[%s206_s0 + $0x8] sm:$0xff]  }
   0x2   :  { %v135_v2 = vunpack.c.l.bf16 %v134_v0  ;;  %v139_v3 = vunpack.c.l.bf16 %v141_v1  ;;  %v136_v4 = vunpack.c.h.bf16 %v134_v0  ;;  %v140_v5 = vunpack.c.h.bf16 %v141_v1  ;;  %v123_v43 = vld [vmem:[%s207_s1] ss:$0 sm:$0xff] }
   0x3   :  { %v124_v45 = vld [vmem:[%s208_s2] ss:$0 sm:$0xff] }
   0x4   :  { %v23_v6 = vsel %vm22_vm0, %v135_v2, 0.0  ;;  %v29_v7 = vsel %vm22_vm0, %v139_v3, 0.0  ;;  %v26_v8 = vsel %vm22_vm0, %v136_v4, 0.0  ;;  %v32_v9 = vsel %vm22_vm0, %v140_v5, 0.0 }
   0x5   :  { %24 = vadd.xlane.f32.xlu0 %v23_v6  ;;  %30 = vadd.xlane.f32.xlu1 %v29_v7 }
   0x9   :  { %27 = vadd.xlane.f32.xlu0 %v26_v8  ;;  %33 = vadd.xlane.f32.xlu1 %v32_v9 }
  0x92   :  { %v25_v10 = vpop.xlane.xlu0 %24  ;;  %v31_v11 = vpop.xlane.xlu1 %30 }
  0x93   :  { %v36_v12 = vmul.f32 0.03125, %v25_v10  ;;  %v38_v13 = vmul.f32 0.03125, %v31_v11 }
  0x95   :  { %v40_v14 = vsub.f32 %v135_v2, %v36_v12  ;;  %v42_v15 = vsub.f32 %v139_v3, %v38_v13 }
  0x96   :  { %v28_v16 = vpop.xlane.xlu0 %27  ;;  %v34_v17 = vpop.xlane.xlu1 %33 }
  0x97   :  { %v37_v18 = vmul.f32 0.03125, %v28_v16  ;;  %v39_v19 = vmul.f32 0.03125, %v34_v17  ;;  %v44_v20 = vmul.f32 %v40_v14, %v40_v14  ;;  %v46_v21 = vmul.f32 %v42_v15, %v42_v15 }
  0x99   :  { %v41_v22 = vsub.f32 %v136_v4, %v37_v18  ;;  %v43_v23 = vsub.f32 %v140_v5, %v39_v19  ;;  %v48_v24 = vsel %vm22_vm0, %v44_v20, 0.0  ;;  %v54_v25 = vsel %vm22_vm0, %v46_v21, 0.0 }
  0x9a   :  { %49 = vadd.xlane.f32.xlu0 %v48_v24 }
  0x9b   :  { %v45_v26 = vmul.f32 %v41_v22, %v41_v22  ;;  %v47_v27 = vmul.f32 %v43_v23, %v43_v23 }
  0x9d   :  { %v51_v28 = vsel %vm22_vm0, %v45_v26, 0.0  ;;  %v57_v29 = vsel %vm22_vm0, %v47_v27, 0.0 }
  0x9e   :  { %55 = vadd.xlane.f32.xlu0 %v54_v25  ;;  %52 = vadd.xlane.f32.xlu1 %v51_v28 }
  0xa2   :  { %58 = vadd.xlane.f32.xlu1 %v57_v29 }
 0x127   :  { %v50_v30 = vpop.xlane.xlu0 %49 }
 0x128   :  { %v60_v31 = vmul.f32 0.03125, %v50_v30 }
 0x12a   :  { %v64_v32 = vadd.f32 1e-05, %v60_v31 }
 0x12b   :  { %v53_v33 = vpop.xlane.xlu1 %52  ;;  %v56_v34 = vpop.xlane.xlu0 %55 }
 0x12c   :  { %142 = vrsqrt.f32 %v64_v32  ;;  %v61_v35 = vmul.f32 0.03125, %v53_v33  ;;  %v62_v36 = vmul.f32 0.03125, %v56_v34 }
 0x12e   :  { %v65_v37 = vadd.f32 1e-05, %v61_v35  ;;  %v66_v38 = vadd.f32 1e-05, %v62_v36 }
 0x12f   :  { %v59_v39 = vpop.xlane.xlu1 %58 }
 0x130   :  { %144 = vrsqrt.f32 %v65_v37  ;;  %v63_v40 = vmul.f32 0.03125, %v59_v39 }
 0x131   :  { %146 = vrsqrt.f32 %v66_v38 }
 0x132   :  { %v67_v41 = vadd.f32 1e-05, %v63_v40 }
 0x134   :  { %148 = vrsqrt.f32 %v67_v41 }
 0x136   :  { %v143_v42 = vpop.eup %142 }
 0x137   :  { %v72_v44 = vmul.f32 %v143_v42, %v40_v14 }
 0x139   :  { %v83_v46 = vmul.f32 %v123_v43, %v72_v44 }
 0x13a   :  { %v145_v47 = vpop.eup %144 }
 0x13b   :  { %v147_v48 = vpop.eup %146  ;;  %v94_v49 = vadd.f32 %v124_v45, %v83_v46  ;;  %v73_v50 = vmul.f32 %v145_v47, %v41_v22 }
 0x13c   :  { %v74_v51 = vmul.f32 %v147_v48, %v42_v15 }
 0x13d   :  { %v129_v52 = vpack.c.bf16 %v94_v49, %v94_v49  ;;  %v84_v53 = vmul.f32 %v123_v43, %v73_v50 }
 0x13e   :  { %v149_v54 = vpop.eup %148  ;;  %v85_v55 = vmul.f32 %v123_v43, %v74_v51 }
 0x13f   :  { %115 = vst.msk [vmem:[%s209_s3] sm:$0xf] %vm114_vm1, %v129_v52  ;;  %v95_v56 = vadd.f32 %v124_v45, %v84_v53  ;;  %v75_v57 = vmul.f32 %v149_v54, %v43_v23 }
 0x140   :  { %v96_v58 = vadd.f32 %v124_v45, %v85_v55 }
 0x141   :  { %v130_v59 = vpack.c.bf16 %v95_v56, %v95_v56  ;;  %v86_v60 = vmul.f32 %v123_v43, %v75_v57 }
 0x142   :  { %v131_v61 = vpack.c.bf16 %v96_v58, %v96_v58 }
 0x143   :  { %116 = vst.msk [vmem:[%s209_s3 + $0x4] sm:$0xf] %vm114_vm1, %v130_v59  ;;  %v97_v62 = vadd.f32 %v124_v45, %v86_v60 }
 0x144   :  { %117 = vst.msk [vmem:[%s209_s3 + $0x8] sm:$0xf] %vm114_vm1, %v131_v61 }
 0x145   :  { %v132_v63 = vpack.c.bf16 %v97_v62, %v97_v62 }
 0x147   :  { %118 = vst.msk [vmem:[%s209_s3 + $0xc] sm:$0xf] %vm114_vm1, %v132_v63 }

// kernel: cformer_stage1.10
= control target key start
LH: loop header
LB: loop body
LE: loop exit
PB: predicated region body
PF: predicated region fallthrough
CT: control target
= control target key end

     0   :  { %vm19_vm0 = vcmask 261120   ;;  %v201_v1 = vmov 0.0   ;;  %vm160_vm1 = vcmask 257024   ;;  %s259_s1 = inlined_call_operand.vmem [shape: bf16[32,32], index: 1, kind: input, shape index: {}]   ;;  %s260_s0 = inlined_call_operand.vmem [shape: bf16[32,32], index: 0, kind: input, shape index: {}]   ;;  %s261_s2 = inlined_call_operand.vmem [shape: f32[1,32], index: 2, kind: input, shape index: {}]   ;;  %s262_s3 = inlined_call_operand.vmem [shape: bf16[32,32], index: 3, kind: output, shape index: {}]  }
   0x1   :  { %v197_v0 = vld [vmem:[%s259_s1] sm:$0xff]   ;;  %22 = vst.msk [vmem:[#allocation2 + $0x10] sm:$0xff] %vm19_vm0, %v201_v1  ;;  %20 = vst.msk [vmem:[#allocation2] sm:$0xff] %vm19_vm0, %v201_v1  ;;  %v198_v2 = vld [vmem:[%s259_s1 + $0x8] sm:$0xff]  }
   0x2   :  { %21 = vst.msk [vmem:[#allocation2 + $0x8] sm:$0xff] %vm19_vm0, %v201_v1  ;;  %23 = vst.msk [vmem:[#allocation2 + $0x18] sm:$0xff] %vm19_vm0, %v201_v1  ;;  %188 = vmatprep.subr.bf16.mxu0 %v197_v0  ;;  %v199_v3 = vld [vmem:[%s260_s0] sm:$0xff]   ;;  %v200_v4 = vld [vmem:[%s260_s0 + $0x8] sm:$0xff]  }
   0x3   :  { %189 = vmatpush3.bf16.msra.mxu0 %v197_v0  ;;  %192 = vmatprep.mubr.msk.bf16.mxu0 %vm19_vm0, %v199_v3  ;;  %v175_v17 = vld [vmem:[%s261_s2] ss:$0 sm:$0xff] }
   0x4   :  { %190 = vmatprep.subr.bf16.mxu0 %v198_v2 }
   0x7   :  { %191 = vmatpush3.bf16.msra.mxu0 %v198_v2 }
   0x8   :  { %v26_v5 = vld [vmem:[#allocation2 + $0x10] sm:$0xff]  ;;  %v24_v6 = vld [vmem:[#allocation2] sm:$0xff] }
   0x9   :  { %v27_v8 = vld [vmem:[#allocation2 + $0x18] sm:$0xff]  ;;  %v25_v11 = vld [vmem:[#allocation2 + $0x8] sm:$0xff] }
   0xa   :  { %193 = vmatmul.mubr.msk.bf16.vlgmr.msra.gmra.mrb[0].mxu0 %vm19_vm0, %v200_v4 }
  0xdd   :  { %v194_v7 = vpop.f32.mrb[0].mxu0 }
  0xde   :  { %v116_v9 = vadd.f32 %v194_v7, %v26_v5  ;;  %v99_v10 = vpop.f32.mrb[1].mxu0 }
  0xdf   :  { %v114_v12 = vadd.f32 %v99_v10, %v24_v6  ;;  %v195_v13 = vpop.f32.mrb[2].mxu0 }
  0xe0   :  { %120 = vst.msk [vmem:[#allocation2 + $0x10] sm:$0xff] %vm19_vm0, %v116_v9  ;;  %v117_v14 = vadd.f32 %v195_v13, %v27_v8  ;;  %v102_v15 = vpop.f32.mrb[3].mxu0 }
  0xe1   :  { %118 = vst.msk [vmem:[#allocation2] sm:$0xff] %vm19_vm0, %v114_v12  ;;  %v115_v16 = vadd.f32 %v102_v15, %v25_v11 }
  0xe2   :  { %121 = vst.msk [vmem:[#allocation2 + $0x18] sm:$0xff] %vm19_vm0, %v117_v14 }
  0xe3   :  { %119 = vst.msk [vmem:[#allocation2 + $0x8] sm:$0xff] %vm19_vm0, %v115_v16 }
  0xe7   :  { %v127_v18 = vld [vmem:[#allocation2 + $0x10] sm:$0xff] }
  0xe8   :  { %v138_v19 = vadd.f32 %v175_v17, %v127_v18  ;;  %v125_v20 = vld [vmem:[#allocation2] sm:$0xff] }
  0xe9   :  { %v136_v21 = vadd.f32 %v175_v17, %v125_v20  ;;  %v128_v22 = vld [vmem:[#allocation2 + $0x18] sm:$0xff] }
  0xea   :  { %v142_v23 = vmul.f32 0.5, %v138_v19  ;;  %v139_v24 = vadd.f32 %v175_v17, %v128_v22  ;;  %v126_v25 = vld [vmem:[#allocation2 + $0x8] sm:$0xff] }
  0xeb   :  { %v140_v26 = vmul.f32 0.5, %v136_v21  ;;  %v137_v27 = vadd.f32 %v175_v17, %v126_v25 }
  0xec   :  { %v182_v28 = vpack.c.bf16 %v142_v23, %v142_v23  ;;  %v143_v29 = vmul.f32 0.5, %v139_v24 }
  0xed   :  { %v180_v30 = vpack.c.bf16 %v140_v26, %v140_v26  ;;  %v141_v31 = vmul.f32 0.5, %v137_v27 }
  0xee   :  { %163 = vst.msk [vmem:[%s262_s3 + $0x8] sm:$0xf] %vm160_vm1, %v182_v28  ;;  %v183_v32 = vpack.c.bf16 %v143_v29, %v143_v29 }
  0xef   :  { %161 = vst.msk [vmem:[%s262_s3] sm:$0xf] %vm160_vm1, %v180_v30  ;;  %v181_v33 = vpack.c.bf16 %v141_v31, %v141_v31 }
  0xf0   :  { %164 = vst.msk [vmem:[%s262_s3 + $0xc] sm:$0xf] %vm160_vm1, %v183_v32 }
  0xf1   :  { %162 = vst.msk [vmem:[%s262_s3 + $0x4] sm:$0xf] %vm160_vm1, %v181_v33 }

// kernel: cformer_stage1.14
= control target key start
LH: loop header
LB: loop body
LE: loop exit
PB: predicated region body
PF: predicated region fallthrough
CT: control target
= control target key end

     0   :  { %vm22_vm0 = vcmask 261120   ;;  %v221_v1 = vmov 0.0   ;;  %vm171_vm1 = vcmask 257024   ;;  %s290_s1 = inlined_call_operand.vmem [shape: bf16[32,32], index: 1, kind: input, shape index: {}]   ;;  %s291_s0 = inlined_call_operand.vmem [shape: bf16[32,32], index: 0, kind: input, shape index: {}]   ;;  %s292_s3 = inlined_call_operand.vmem [shape: bf16[32,32], index: 3, kind: input, shape index: {}]   ;;  %s293_s2 = inlined_call_operand.vmem [shape: f32[1,32], index: 2, kind: input, shape index: {}]   ;;  %s294_s4 = inlined_call_operand.vmem [shape: bf16[32,32], index: 4, kind: output, shape index: {}]  }
   0x1   :  { %v217_v0 = vld [vmem:[%s290_s1] sm:$0xff]   ;;  %25 = vst.msk [vmem:[#allocation2 + $0x10] sm:$0xff] %vm22_vm0, %v221_v1  ;;  %23 = vst.msk [vmem:[#allocation2] sm:$0xff] %vm22_vm0, %v221_v1  ;;  %v218_v2 = vld [vmem:[%s290_s1 + $0x8] sm:$0xff]  }
   0x2   :  { %24 = vst.msk [vmem:[#allocation2 + $0x8] sm:$0xff] %vm22_vm0, %v221_v1  ;;  %26 = vst.msk [vmem:[#allocation2 + $0x18] sm:$0xff] %vm22_vm0, %v221_v1  ;;  %208 = vmatprep.subr.bf16.mxu0 %v217_v0  ;;  %v219_v3 = vld [vmem:[%s291_s0] sm:$0xff]   ;;  %v220_v4 = vld [vmem:[%s291_s0 + $0x8] sm:$0xff]  }
   0x3   :  { %209 = vmatpush3.bf16.msra.mxu0 %v217_v0  ;;  %212 = vmatprep.mubr.msk.bf16.mxu0 %vm22_vm0, %v219_v3  ;;  %v203_v17 = vld [vmem:[%s292_s3 + $0x8] sm:$0xff]   ;;  %v196_v18 = vld [vmem:[%s292_s3] sm:$0xff]  }
   0x4   :  { %210 = vmatprep.subr.bf16.mxu0 %v218_v2  ;;  %v186_v19 = vld [vmem:[%s293_s2] ss:$0 sm:$0xff]  ;;  %v201_v20 = vunpack.c.l.bf16 %v203_v17  ;;  %v197_v22 = vunpack.c.l.bf16 %v196_v18  ;;  %v202_v25 = vunpack.c.h.bf16 %v203_v17  ;;  %v198_v28 = vunpack.c.h.bf16 %v196_v18 }
   0x7   :  { %211 = vmatpush3.bf16.msra.mxu0 %v218_v2 }
   0x8   :  { %v29_v5 = vld [vmem:[#allocation2 + $0x10] sm:$0xff]  ;;  %v27_v6 = vld [vmem:[#allocation2] sm:$0xff] }
   0x9   :  { %v30_v8 = vld [vmem:[#allocation2 + $0x18] sm:$0xff]  ;;  %v28_v11 = vld [vmem:[#allocation2 + $0x8] sm:$0xff] }
   0xa   :  { %213 = vmatmul.mubr.msk.bf16.vlgmr.msra.gmra.mrb[0].mxu0 %vm22_vm0, %v220_v4 }
  0xdd   :  { %v214_v7 = vpop.f32.mrb[0].mxu0 }
  0xde   :  { %v119_v9 = vadd.f32 %v214_v7, %v29_v5  ;;  %v102_v10 = vpop.f32.mrb[1].mxu0 }
  0xdf   :  { %v117_v12 = vadd.f32 %v102_v10, %v27_v6  ;;  %v215_v13 = vpop.f32.mrb[2].mxu0 }
  0xe0   :  { %123 = vst.msk [vmem:[#allocation2 + $0x10] sm:$0xff] %vm22_vm0, %v119_v9  ;;  %v120_v14 = vadd.f32 %v215_v13, %v30_v8  ;;  %v105_v15 = vpop.f32.mrb[3].mxu0 }
  0xe1   :  { %121 = vst.msk [vmem:[#allocation2] sm:$0xff] %vm22_vm0, %v117_v12  ;;  %v118_v16 = vadd.f32 %v105_v15, %v28_v11 }
  0xe2   :  { %124 = vst.msk [vmem:[#allocation2 + $0x18] sm:$0xff] %vm22_vm0, %v120_v14 }
  0xe3   :  { %122 = vst.msk [vmem:[#allocation2 + $0x8] sm:$0xff] %vm22_vm0, %v118_v16 }
  0xe7   :  { %v130_v21 = vld [vmem:[#allocation2 + $0x10] sm:$0xff] }
  0xe8   :  { %v141_v23 = vadd.f32 %v186_v19, %v130_v21  ;;  %v128_v24 = vld [vmem:[#allocation2] sm:$0xff] }
  0xe9   :  { %v139_v26 = vadd.f32 %v186_v19, %v128_v24  ;;  %v131_v27 = vld [vmem:[#allocation2 + $0x18] sm:$0xff] }
  0xea   :  { %v153_v29 = vadd.f32 %v201_v20, %v141_v23  ;;  %v142_v30 = vadd.f32 %v186_v19, %v131_v27  ;;  %v129_v31 = vld [vmem:[#allocation2 + $0x8] sm:$0xff] }
  0xeb   :  { %v151_v32 = vadd.f32 %v197_v22, %v139_v26  ;;  %v140_v33 = vadd.f32 %v186_v19, %v129_v31 }
  0xec   :  { %v193_v34 = vpack.c.bf16 %v153_v29, %v153_v29  ;;  %v154_v35 = vadd.f32 %v202_v25, %v142_v30 }
  0xed   :  { %v191_v36 = vpack.c.bf16 %v151_v32, %v151_v32  ;;  %v152_v37 = vadd.f32 %v198_v28, %v140_v33 }
  0xee   :  { %174 = vst.msk [vmem:[%s294_s4 + $0x8] sm:$0xf] %vm171_vm1, %v193_v34  ;;  %v194_v38 = vpack.c.bf16 %v154_v35, %v154_v35 }
  0xef   :  { %172 = vst.msk [vmem:[%s294_s4] sm:$0xf] %vm171_vm1, %v191_v36  ;;  %v192_v39 = vpack.c.bf16 %v152_v37, %v152_v37 }
  0xf0   :  { %175 = vst.msk [vmem:[%s294_s4 + $0xc] sm:$0xf] %vm171_vm1, %v194_v38 }
  0xf1   :  { %173 = vst.msk [vmem:[%s294_s4 + $0x4] sm:$0xf] %vm171_vm1, %v192_v39 }

// kernel: cformer_stage1.16
= control target key start
LH: loop header
LB: loop body
LE: loop exit
PB: predicated region body
PF: predicated region fallthrough
CT: control target
= control target key end

     0   :  { %vm19_vm0 = vcmask 523264   ;;  %v242_v1 = vmov 0.0   ;;  %vm58_vm1 = vcmask 261120   ;;  %vm193_vm2 = vcmask 519168   ;;  %s298_s1 = inlined_call_operand.vmem [shape: bf16[32,64], index: 1, kind: input, shape index: {}]   ;;  %s299_s0 = inlined_call_operand.vmem [shape: bf16[32,32], index: 0, kind: input, shape index: {}]   ;;  %s300_s2 = inlined_call_operand.vmem [shape: f32[1,64], index: 2, kind: input, shape index: {}]   ;;  %s301_s3 = inlined_call_operand.vmem [shape: bf16[32,64], index: 3, kind: output, shape index: {}]  }
   0x1   :  { %v230_v0 = vld [vmem:[%s298_s1] sm:$0xff]   ;;  %22 = vst.msk [vmem:[#allocation2 + $0x10] sm:$0xff] %vm19_vm0, %v242_v1  ;;  %20 = vst.msk [vmem:[#allocation2] sm:$0xff] %vm19_vm0, %v242_v1  ;;  %v231_v2 = vld [vmem:[%s298_s1 + $0x8] sm:$0xff]  }
   0x2   :  { %21 = vst.msk [vmem:[#allocation2 + $0x8] sm:$0xff] %vm19_vm0, %v242_v1  ;;  %23 = vst.msk [vmem:[#allocation2 + $0x18] sm:$0xff] %vm19_vm0, %v242_v1  ;;  %221 = vmatprep.subr.bf16.mxu0 %v230_v0  ;;  %v232_v3 = vld [vmem:[%s299_s0] sm:$0xff]   ;;  %v233_v4 = vld [vmem:[%s299_s0 + $0x8] sm:$0xff]  }
   0x3   :  { %222 = vmatpush3.bf16.msra.mxu0 %v230_v0  ;;  %225 = vmatprep.mubr.msk.bf16.mxu0 %vm58_vm1, %v232_v3  ;;  %v208_v17 = vld [vmem:[%s300_s2] ss:$0 sm:$0xff] }
   0x4   :  { %223 = vmatprep.subr.bf16.mxu0 %v231_v2 }
   0x7   :  { %224 = vmatpush3.bf16.msra.mxu0 %v231_v2 }
   0x8   :  { %v26_v5 = vld [vmem:[#allocation2 + $0x10] sm:$0xff]  ;;  %v24_v6 = vld [vmem:[#allocation2] sm:$0xff] }
   0x9   :  { %v27_v8 = vld [vmem:[#allocation2 + $0x18] sm:$0xff]  ;;  %v25_v11 = vld [vmem:[#allocation2 + $0x8] sm:$0xff] }
   0xa   :  { %226 = vmatmul.mubr.msk.bf16.vlgmr.msra.gmra.mrb[0].mxu0 %vm58_vm1, %v233_v4 }
  0xdd   :  { %v227_v7 = vpop.f32.mrb[0].mxu0 }
  0xde   :  { %v116_v9 = vadd.f32 %v227_v7, %v26_v5  ;;  %v99_v10 = vpop.f32.mrb[1].mxu0 }
  0xdf   :  { %v114_v12 = vadd.f32 %v99_v10, %v24_v6  ;;  %v228_v13 = vpop.f32.mrb[2].mxu0 }
  0xe0   :  { %121 = vst.msk [vmem:[#allocation2 + $0x10] sm:$0xff] %vm19_vm0, %v116_v9  ;;  %v117_v14 = vadd.f32 %v228_v13, %v27_v8  ;;  %v102_v15 = vpop.f32.mrb[3].mxu0 }
  0xe1   :  { %119 = vst.msk [vmem:[#allocation2] sm:$0xff] %vm19_vm0, %v114_v12  ;;  %v115_v16 = vadd.f32 %v102_v15, %v25_v11 }
  0xe2   :  { %122 = vst.msk [vmem:[#allocation2 + $0x18] sm:$0xff] %vm19_vm0, %v117_v14 }
  0xe3   :  { %120 = vst.msk [vmem:[#allocation2 + $0x8] sm:$0xff] %vm19_vm0, %v115_v16 }
  0xe7   :  { %v128_v18 = vld [vmem:[#allocation2 + $0x10] sm:$0xff] }
  0xe8   :  { %v139_v19 = vadd.f32 %v208_v17, %v128_v18  ;;  %v126_v20 = vld [vmem:[#allocation2] sm:$0xff] }
  0xe9   :  { %v137_v21 = vadd.f32 %v208_v17, %v126_v20  ;;  %v129_v22 = vld [vmem:[#allocation2 + $0x18] sm:$0xff] }
  0xea   :  { %v147_v23 = vmul.f32 %v139_v19, %v139_v19  ;;  %v140_v24 = vadd.f32 %v208_v17, %v129_v22  ;;  %v127_v25 = vld [vmem:[#allocation2 + $0x8] sm:$0xff]  ;;  %v143_v48 = vmul.f32 0.5, %v139_v19 }
  0xeb   :  { %v145_v26 = vmul.f32 %v137_v21, %v137_v21  ;;  %v138_v27 = vadd.f32 %v208_v17, %v127_v25  ;;  %v141_v51 = vmul.f32 0.5, %v137_v21 }
  0xec   :  { %v151_v28 = vmul.f32 %v147_v23, %v139_v19  ;;  %v148_v29 = vmul.f32 %v140_v24, %v140_v24  ;;  %v144_v55 = vmul.f32 0.5, %v140_v24 }
  0xed   :  { %v149_v30 = vmul.f32 %v145_v26, %v137_v21  ;;  %v146_v31 = vmul.f32 %v138_v27, %v138_v27  ;;  %v142_v58 = vmul.f32 0.5, %v138_v27 }
  0xee   :  { %v155_v32 = vmul.f32 0.044715, %v151_v28  ;;  %v152_v33 = vmul.f32 %v148_v29, %v140_v24 }
  0xef   :  { %v153_v34 = vmul.f32 0.044715, %v149_v30  ;;  %v150_v35 = vmul.f32 %v146_v31, %v138_v27 }
  0xf0   :  { %v159_v36 = vadd.f32 %v155_v32, %v139_v19  ;;  %v156_v37 = vmul.f32 0.044715, %v152_v33 }
  0xf1   :  { %v157_v38 = vadd.f32 %v153_v34, %v137_v21  ;;  %v154_v39 = vmul.f32 0.044715, %v150_v35 }
  0xf2   :  { %v163_v40 = vmul.f32 0.7978846, %v159_v36  ;;  %v160_v41 = vadd.f32 %v156_v37, %v140_v24 }
  0xf3   :  { %v161_v42 = vmul.f32 0.7978846, %v157_v38  ;;  %v158_v43 = vadd.f32 %v154_v39, %v138_v27 }
  0xf4   :  { %234 = vtanh.f32 %v163_v40  ;;  %v164_v44 = vmul.f32 0.7978846, %v160_v41 }
  0xf5   :  { %236 = vtanh.f32 %v161_v42  ;;  %v162_v45 = vmul.f32 0.7978846, %v158_v43 }
  0xf6   :  { %238 = vtanh.f32 %v164_v44 }
  0xf7   :  { %240 = vtanh.f32 %v162_v45 }
  0xfe   :  { %v235_v46 = vpop.eup %234 }
  0xff   :  { %v237_v47 = vpop.eup %236  ;;  %v171_v49 = vadd.f32 1.0, %v235_v46 }
 0x100   :  { %v239_v50 = vpop.eup %238  ;;  %v169_v52 = vadd.f32 1.0, %v237_v47 }
 0x101   :  { %v241_v53 = vpop.eup %240  ;;  %v175_v54 = vmul.f32 %v171_v49, %v143_v48  ;;  %v172_v56 = vadd.f32 1.0, %v239_v50 }
 0x102   :  { %v173_v57 = vmul.f32 %v169_v52, %v141_v51  ;;  %v170_v59 = vadd.f32 1.0, %v241_v53 }
 0x103   :  { %v215_v60 = vpack.c.bf16 %v175_v54, %v175_v54  ;;  %v176_v61 = vmul.f32 %v172_v56, %v144_v55 }
 0x104   :  { %v213_v62 = vpack.c.bf16 %v173_v57, %v173_v57  ;;  %v174_v63 = vmul.f32 %v170_v59, %v142_v58 }
 0x105   :  { %196 = vst.msk [vmem:[%s301_s3 + $0x8] sm:$0xf] %vm193_vm2, %v215_v60  ;;  %v216_v0 = vpack.c.bf16 %v176_v61, %v176_v61 }
 0x106   :  { %194 = vst.msk [vmem:[%s301_s3] sm:$0xf] %vm193_vm2, %v213_v62  ;;  %v214_v1 = vpack.c.bf16 %v174_v63, %v174_v63 }
 0x107   :  { %197 = vst.msk [vmem:[%s301_s3 + $0xc] sm:$0xf] %vm193_vm2, %v216_v0 }
 0x108   :  { %195 = vst.msk [vmem:[%s301_s3 + $0x4] sm:$0xf] %vm193_vm2, %v214_v1 }

// kernel: cformer_stage1.13
= control target key start
LH: loop header
LB: loop body
LE: loop exit
PB: predicated region body
PF: predicated region fallthrough
CT: control target
= control target key end

     0   :  { %s2153_s0 = inlined_call_operand.vmem [shape: s32[2], index: 0, kind: input, shape index: {}]   ;;  %s2154_s1 = inlined_call_operand.vmem [shape: bf16[2,16,32], index: 1, kind: input, shape index: {}]   ;;  %s2155_s2 = inlined_call_operand.vmem [shape: bf16[2,16,32], index: 2, kind: input, shape index: {}]   ;;  %s2156_s3 = inlined_call_operand.vmem [shape: bf16[2,16,32], index: 3, kind: input, shape index: {}]   ;;  %s2157_s4 = inlined_call_operand.vmem [shape: bf16[2,16,32], index: 4, kind: output, shape index: {}]  }
   0x1   :  { %s9_s17 = sshll.u32 %s2153_s0, 4  ;;  %s10_s17 = int_to_ptr.vmem [resolvable:$true] %s9_s17 }
   0x2   :  { %s1776_s18 = scalar_lea.vmem %s10_s17, 16  ;;  %p1781_p1 = scmp.lt.s32.totalorder %s10_s17, %s10_s17 }
   0x3   :  { %p1777_p0 = scmp.ne.s32.totalorder %s10_s17, %s1776_s18  ;;  %p1782_p2 = scmp.lt.s32.totalorder %s1776_s18, %s1776_s18 }
   0x5   :  { %p1783_p3 = por %p1782_p2, %p1781_p1 }
   0x7   :  { %p1784_p4 = pnand %p1783_p3, %p1777_p0 }
   0x9   :  { %1787 = shalt.err (!%p1784_p4)  }
   0xa   :  { %s1814_s19 = smov [#allocation3]  }
   0xb   :  { %12 = dma.vmem_to_smem %s10_s17, 16, %s1814_s19, [#allocation2] }
   0xc   :  { %1800 = dma.done.wait [#allocation2], 16 }
   0xd   :  { %1801 = vsyncadd [#allocation2], 4294967280 }
   0xe   :  { %14 = sfence }
   0xf   :  { %s1859_s20 = smov 0   ;;  %s1861_s21 = smov 0  }
  0x10   :  { %s1863_s22 = smov 0  }
  0x11 LB: > { %s32_s0 = sadd.s32 1, %s1808_s21  ;;  %p1474_p5 = scmp.ge.s32.totalorder %s1812_s22, 1  ;;  %s1812_s22 = sphi %s1863_s22, %s20_s22   ;;  %s1808_s21 = sphi %s1861_s21, %s2159_s21   ;;  %s1804_s20 = sphi %s1859_s20, %s2158_s20  }
  0x12   : > { %p34_p6 = scmp.ge.s32.totalorder %s32_s0, 2  ;;  %p185_p7 = scmp.lt.s32.totalorder %s1812_s22, 3 }
  0x14   : > { %s2161_s0 = smov (%p34_p6, %s32_s0), 0  ;;  %p186_p8 = pnand %p1474_p5, %p185_p7 }
  0x15   : > { %p228_p9 = scmp.lt.s32.totalorder (!%p186_p8), %s1804_s20, 1  ;;  %v1815_v0 = vmov (!%p186_p8), 0.0   ;;  %vm1816_vm0 = vmmov (!%p186_p8), 0   ;;  %vm274_vm1 = vcmask (!%p186_p8), 31744   ;;  %vm322_vm2 = vcmask (!%p186_p8), 130048   ;;  %s1817_s30 = smov (!%p186_p8), 124  }
  0x16   : > { %189 = sbr.rel (%p186_p8) target bundleno = 1554 (0x612), region = 32  ;;  %1572 = vmatprep.subr.bf16.mxu0 (!%p186_p8), %v1815_v0  ;;  %1574 = vmatprep.mubr.msk.bf16.mxu0 (!%p186_p8), %vm1816_vm0, %v1815_v0  ;;  %s1818_s5 = smov (!%p186_p8), 116   ;;  %vm404_vm3 = vcmask (!%p186_p8), 27648   ;;  %vm540_vm4 = vcmask (!%p186_p8), 60448   ;;  %vm676_vm5 = vcmask (!%p186_p8), 93248   ;;  %vm812_vm6 = vcmask (!%p186_p8), 126048  }
  0x17   : > { %1578 = vmatprep.subr.bf16.mxu1 (!%p186_p8), %v1815_v0  ;;  %1580 = vmatprep.mubr.msk.bf16.mxu1 (!%p186_p8), %vm1816_vm0, %v1815_v0  ;;  %s1819_s6 = smov (!%p186_p8), 112   ;;  %s1820_s7 = smov (!%p186_p8), 108   ;;  %vm948_vm7 = vcmask (!%p186_p8), 158848   ;;  %vm1084_vm8 = vcmask (!%p186_p8), 191648   ;;  %vm1220_vm9 = vcmask (!%p186_p8), 224448   ;;  %vm1356_vm10 = vcmask (!%p186_p8), 257248  }
  0x18   : > { %s1821_s8 = smov (!%p186_p8), 104   ;;  %s1822_s9 = smov (!%p186_p8), 100  }
  0x19   : > { %s1823_s13 = smov (!%p186_p8), 120   ;;  %s1824_s17 = smov (!%p186_p8), 4  }
  0x1a   : > { %s1825_s18 = smov (!%p186_p8), 8   ;;  %s1826_s19 = smov (!%p186_p8), 12  }
  0x1b   : > { %s1829_s24 = smov (!%p186_p8), 24   ;;  %s1830_s25 = smov (!%p186_p8), 28  }
  0x1d   : > { %s2163_s20 = smov (!%p228_p9, %s1804_s20), 1 }
  0x1e   : > { %s1883_s23 = sshll.u32 %s2163_s20, 3  ;;  %s1827_s20 = smov 16  }
  0x1f   : > { %s241_s26 = scalar_lea.vmem %s2155_s2, %s1883_s23  ;;  %s235_s29 = scalar_lea.vmem %s2154_s1, %s1883_s23 }
  0x20   : > { %v1709_v1 = vld [vmem:[%s241_s26] sm:$0xff]   ;;  %s246_s12 = scalar_lea.vmem %s2156_s3, %s1883_s23  ;;  %s1963_s16 = scalar_lea.vmem %s2157_s4, %s1883_s23 }
  0x21   : > { %v279_v2 = vsel %vm274_vm1, %v1709_v1, 0  ;;  %v1710_v3 = vld [vmem:[%s235_s29] sm:$0xff]   ;;  %s1828_s23 = smov 20  }
  0x22   : > { %1573 = vmatpush3.bf16.xpose.msra.mxu0 %v279_v2  ;;  %v1912_v20 = vld [vmem:[%s246_s12] sm:$0xff]  }
  0x23   : > { %1590 = vmatprep.subr.bf16.mxu0 %v1815_v0  ;;  %1579 = vmatpush3.bf16.msra.mxu1 %v1912_v20 }
  0x24   : > { %1584 = vmatprep.subr.bf16.mxu1 %v1815_v0 }
  0x29   : > { %1575 = vmatmul.mubr.msk.bf16.vlgmr.msra.gmra.mrb[0].mxu0 %vm274_vm1, %v1710_v3 }
  0x2a   : > { %1592 = vmatprep.mubr.msk.bf16.mxu0 %vm1816_vm0, %v1815_v0 }
  0xfc   : > { %v315_v4 = vpop.f32.mrb[0].mxu0 }
  0xfd   : > { %v1576_v5 = vpop.f32.mrb[1].mxu0  ;;  %v323_v6 = vsel %vm322_vm2, %v315_v4, -inf }
  0xfe   : > { %324 = vmax.xlane.f32.xlu0 %v323_v6  ;;  %v318_v7 = vpop.f32.mrb[2].mxu0 }
  0xff   : > { %v1577_v8 = vpop.f32.mrb[3].mxu0  ;;  %v326_v9 = vsel %vm322_vm2, %v318_v7, -inf }
 0x102   : > { %327 = vmax.xlane.f32.xlu0 %v326_v9 }
 0x118   : > { %409 = vrot.lane.b32.xlu0 %v1709_v1, %s1817_s30 }
 0x11c   : > { %681 = vrot.lane.b32.xlu0 %v1709_v1, %s1818_s5 }
 0x120   : > { %817 = vrot.lane.b32.xlu0 %v1709_v1, %s1819_s6 }
 0x124   : > { %953 = vrot.lane.b32.xlu0 %v1709_v1, %s1820_s7 }
 0x128   : > { %1089 = vrot.lane.b32.xlu0 %v1709_v1, %s1821_s8 }
 0x12c   : > { %1225 = vrot.lane.b32.xlu0 %v1709_v1, %s1822_s9 }
 0x18b   : > { %v325_v10 = vpop.xlane.xlu0 %324 }
 0x18c   : > { %v329_v11 = vsub.f32 %v315_v4, %v325_v10 }
 0x18e   : > { %v331_v12 = vmul.f32 1.442695, %v329_v11 }
 0x18f   : > { %v328_v13 = vpop.xlane.xlu0 %327 }
 0x190   : > { %1712 = vpow2.f32 %v331_v12  ;;  %v330_v14 = vsub.f32 %v318_v7, %v328_v13 }
 0x192   : > { %v333_v15 = vmul.f32 1.442695, %v330_v14 }
 0x193   : > { %v410_v25 = vpop.permute.xlu0 %409 }
 0x194   : > { %1714 = vpow2.f32 %v333_v15  ;;  %v415_v29 = vsel %vm274_vm1, %v410_v25, 0 }
 0x197   : > { %v682_v33 = vpop.permute.xlu0 %681 }
 0x198   : > { %v687_v35 = vsel %vm274_vm1, %v682_v33, 0 }
 0x19a   : > { %v1713_v16 = vpop.eup %1712 }
 0x19b   : > { %v335_v17 = vsel %vm322_vm2, %v1713_v16, 0.0  ;;  %v818_v36 = vpop.permute.xlu0 %817 }
 0x19c   : > { %336 = vadd.xlane.f32.xlu1 %v335_v17  ;;  %v823_v38 = vsel %vm274_vm1, %v818_v36, 0 }
 0x19e   : > { %v1715_v18 = vpop.eup %1714 }
 0x19f   : > { %v338_v19 = vsel %vm322_vm2, %v1715_v18, 0.0  ;;  %v954_v39 = vpop.permute.xlu0 %953 }
 0x1a0   : > { %339 = vadd.xlane.f32.xlu1 %v338_v19  ;;  %v959_v41 = vsel %vm274_vm1, %v954_v39, 0 }
 0x1a3   : > { %v1090_v42 = vpop.permute.xlu0 %1089 }
 0x1a4   : > { %v1095_v44 = vsel %vm274_vm1, %v1090_v42, 0 }
 0x1a7   : > { %v1226_v45 = vpop.permute.xlu0 %1225 }
 0x1a8   : > { %v1231_v47 = vsel %vm274_vm1, %v1226_v45, 0 }
 0x1b1   : > { %407 = vrot.lane.b32.xlu1 %v1710_v3, %s1817_s30 }
 0x1b5   : > { %545 = vrot.lane.b32.xlu1 %v1709_v1, %s1823_s13 }
 0x1b9   : > { %543 = vrot.lane.b32.xlu1 %v1710_v3, %s1823_s13 }
 0x1bd   : > { %679 = vrot.lane.b32.xlu1 %v1710_v3, %s1818_s5 }
 0x1c1   : > { %815 = vrot.lane.b32.xlu1 %v1710_v3, %s1819_s6 }
 0x1c5   : > { %951 = vrot.lane.b32.xlu1 %v1710_v3, %s1820_s7 }
 0x1c9   : > { %1087 = vrot.lane.b32.xlu1 %v1710_v3, %s1821_s8 }
 0x1cd   : > { %1223 = vrot.lane.b32.xlu1 %v1710_v3, %s1822_s9 }
 0x229   : > { %v337_v21 = vpop.xlane.xlu1 %336 }
 0x22a   : > { %1716 = vrcp.f32 %v337_v21 }
 0x22d   : > { %v340_v22 = vpop.xlane.xlu1 %339 }
 0x22e   : > { %1718 = vrcp.f32 %v340_v22 }
 0x231   : > { %v408_v28 = vpop.permute.xlu1 %407 }
 0x234   : > { %v1717_v23 = vpop.eup %1716 }
 0x235   : > { %v343_v26 = vmul.f32 %v1717_v23, %v1713_v16  ;;  %v546_v31 = vpop.permute.xlu1 %545 }
 0x236   : > { %v551_v32 = vsel %vm274_vm1, %v546_v31, 0 }
 0x238   : > { %v1719_v24 = vpop.eup %1718 }
 0x239   : > { %v344_v27 = vmul.f32 %v1719_v24, %v1715_v18  ;;  %v544_v34 = vpop.permute.xlu1 %543 }
 0x23b   : > { %v345_v30 = vpack.c.bf16 %v344_v27, %v343_v26 }
 0x23d   : > { %1581 = vmatmul.mubr.msk.bf16.vlgmr.msra.gmra.mrb[0].mxu1 %vm322_vm2, %v345_v30  ;;  %v680_v37 = vpop.permute.xlu1 %679 }
 0x23e   : > { %1585 = vmatpush3.bf16.xpose.msra.mxu1 %v415_v29  ;;  %1586 = vmatprep.mubr.msk.bf16.mxu1 %vm1816_vm0, %v1815_v0 }
 0x23f   : > { %1596 = vmatprep.subr.bf16.mxu1 %v1815_v0 }
 0x241   : > { %v816_v40 = vpop.permute.xlu1 %815 }
 0x245   : > { %1587 = vmatmul.mubr.msk.bf16.vlgmr.msra.gmra.mrb[4].mxu1 %vm274_vm1, %v408_v28  ;;  %v952_v43 = vpop.permute.xlu1 %951 }
 0x246   : > { %1597 = vmatpush3.bf16.xpose.msra.mxu1 %v551_v32  ;;  %1598 = vmatprep.mubr.msk.bf16.mxu1 %vm1816_vm0, %v1815_v0 }
 0x247   : > { %1608 = vmatprep.subr.bf16.mxu1 %v1815_v0 }
 0x249   : > { %v1088_v46 = vpop.permute.xlu1 %1087 }
 0x24d   : > { %1599 = vmatmul.mubr.msk.bf16.vlgmr.msra.gmra.mrb[8].mxu1 %vm274_vm1, %v544_v34  ;;  %v1224_v48 = vpop.permute.xlu1 %1223 }
 0x24e   : > { %1609 = vmatpush3.bf16.xpose.msra.mxu1 %v687_v35  ;;  %1610 = vmatprep.mubr.msk.bf16.mxu1 %vm1816_vm0, %v1815_v0 }
 0x24f   : > { %1620 = vmatprep.subr.bf16.mxu1 %v1815_v0 }
 0x255   : > { %1611 = vmatmul.mubr.msk.bf16.vlgmr.msra.gmra.mrb[12].mxu1 %vm274_vm1, %v680_v37 }
 0x256   : > { %1621 = vmatpush3.bf16.xpose.msra.mxu1 %v823_v38  ;;  %1622 = vmatprep.mubr.msk.bf16.mxu1 %vm1816_vm0, %v1815_v0 }
 0x257   : > { %1632 = vmatprep.subr.bf16.mxu1 %v1815_v0 }
 0x25d   : > { %1623 = vmatmul.mubr.msk.bf16.vlgmr.msra.gmra.mrb[16].mxu1 %vm274_vm1, %v816_v40 }
 0x25e   : > { %1633 = vmatpush3.bf16.xpose.msra.mxu1 %v959_v41  ;;  %1634 = vmatprep.mubr.msk.bf16.mxu1 %vm1816_vm0, %v1815_v0 }
 0x25f   : > { %1644 = vmatprep.subr.bf16.mxu1 %v1815_v0 }
 0x265   : > { %1635 = vmatmul.mubr.msk.bf16.vlgmr.msra.gmra.mrb[20].mxu1 %vm274_vm1, %v952_v43 }
 0x266   : > { %1645 = vmatpush3.bf16.xpose.msra.mxu1 %v1095_v44  ;;  %1646 = vmatprep.mubr.msk.bf16.mxu1 %vm1816_vm0, %v1815_v0 }
 0x267   : > { %1656 = vmatprep.subr.bf16.mxu1 %v1815_v0 }
 0x26d   : > { %1647 = vmatmul.mubr.msk.bf16.vlgmr.msra.gmra.mrb[24].mxu1 %vm274_vm1, %v1088_v46 }
 0x26e   : > { %1657 = vmatpush3.bf16.xpose.msra.mxu1 %v1231_v47  ;;  %1658 = vmatprep.mubr.msk.bf16.mxu1 %vm1816_vm0, %v1815_v0 }
 0x275   : > { %1659 = vmatmul.mubr.msk.bf16.vlgmr.msra.gmra.mrb[28].mxu1 %vm274_vm1, %v1224_v48 }
 0x310   : > { %v389_v49 = vpop.f32.mrb[0].mxu1 }
 0x311   : > { %v1524_v50 = vpack.c.bf16 %v389_v49, %v389_v49  ;;  %v1582_v51 = vpop.f32.mrb[1].mxu1 }
 0x312   : > { %v392_v52 = vpop.f32.mrb[2].mxu1 }
 0x313   : > { %405 = vst.msk [vmem:[%s1963_s16] sm:$0xf] %vm404_vm3, %v1524_v50  ;;  %v1525_v53 = vpack.c.bf16 %v392_v52, %v392_v52  ;;  %v1583_v54 = vpop.f32.mrb[3].mxu1 }
 0x315   : > { %406 = vst.msk [vmem:[%s1963_s16 + $0x4] sm:$0xf] %vm404_vm3, %v1525_v53 }
 0x318   : > { %v451_v55 = vpop.f32.mrb[4].mxu1 }
 0x319   : > { %v1588_v56 = vpop.f32.mrb[5].mxu1  ;;  %v458_v57 = vsel %vm322_vm2, %v451_v55, -inf }
 0x31a   : > { %459 = vmax.xlane.f32.xlu0 %v458_v57  ;;  %v454_v58 = vpop.f32.mrb[6].mxu1 }
 0x31b   : > { %v1589_v59 = vpop.f32.mrb[7].mxu1  ;;  %v461_v60 = vsel %vm322_vm2, %v454_v58, -inf }
 0x31c   : > { %462 = vmax.xlane.f32.xlu1 %v461_v60 }
 0x320   : > { %v587_v61 = vpop.f32.mrb[8].mxu1 }
 0x321   : > { %v1600_v62 = vpop.f32.mrb[9].mxu1  ;;  %v594_v63 = vsel %vm322_vm2, %v587_v61, -inf }
 0x322   : > { %595 = vmax.xlane.f32.xlu0 %v594_v63  ;;  %v590_v1 = vpop.f32.mrb[10].mxu1 }
 0x323   : > { %v1601_v2 = vpop.f32.mrb[11].mxu1  ;;  %v597_v3 = vsel %vm322_vm2, %v590_v1, -inf }
 0x326   : > { %598 = vmax.xlane.f32.xlu0 %v597_v3 }
 0x328   : > { %v1971_v4 = vpop.f32.mrb[12].mxu1 }
 0x329   : > { %v1612_v5 = vpop.f32.mrb[13].mxu1  ;;  %v730_v6 = vsel %vm322_vm2, %v1971_v4, -inf }
 0x32a   : > { %731 = vmax.xlane.f32.xlu0 %v730_v6  ;;  %v1975_v7 = vpop.f32.mrb[14].mxu1 }
 0x32b   : > { %v1613_v8 = vpop.f32.mrb[15].mxu1  ;;  %v733_v9 = vsel %vm322_vm2, %v1975_v7, -inf }
 0x32c   : > { %734 = vmax.xlane.f32.xlu1 %v733_v9 }
 0x330   : > { %v1979_v10 = vpop.f32.mrb[16].mxu1 }
 0x331   : > { %v1624_v11 = vpop.f32.mrb[17].mxu1  ;;  %v866_v12 = vsel %vm322_vm2, %v1979_v10, -inf }
 0x332   : > { %867 = vmax.xlane.f32.xlu0 %v866_v12  ;;  %v1983_v13 = vpop.f32.mrb[18].mxu1 }
 0x333   : > { %v1625_v14 = vpop.f32.mrb[19].mxu1  ;;  %v869_v15 = vsel %vm322_vm2, %v1983_v13, -inf }
 0x334   : > { %870 = vmax.xlane.f32.xlu1 %v869_v15 }
 0x338   : > { %v1987_v16 = vpop.f32.mrb[20].mxu1 }
 0x339   : > { %v1636_v17 = vpop.f32.mrb[21].mxu1  ;;  %v1002_v18 = vsel %vm322_vm2, %v1987_v16, -inf }
 0x33a   : > { %1003 = vmax.xlane.f32.xlu0 %v1002_v18  ;;  %v1991_v19 = vpop.f32.mrb[22].mxu1 }
 0x33b   : > { %v1637_v21 = vpop.f32.mrb[23].mxu1  ;;  %v1005_v22 = vsel %vm322_vm2, %v1991_v19, -inf }
 0x33c   : > { %1006 = vmax.xlane.f32.xlu1 %v1005_v22 }
 0x340   : > { %v1995_v23 = vpop.f32.mrb[24].mxu1 }
 0x341   : > { %v1648_v24 = vpop.f32.mrb[25].mxu1  ;;  %v1138_v25 = vsel %vm322_vm2, %v1995_v23, -inf }
 0x342   : > { %1139 = vmax.xlane.f32.xlu0 %v1138_v25  ;;  %v1999_v26 = vpop.f32.mrb[26].mxu1 }
 0x343   : > { %v1649_v27 = vpop.f32.mrb[27].mxu1  ;;  %v1141_v28 = vsel %vm322_vm2, %v1999_v26, -inf }
 0x344   : > { %1142 = vmax.xlane.f32.xlu1 %v1141_v28 }
 0x348   : > { %v2003_v29 = vpop.f32.mrb[28].mxu1 }
 0x349   : > { %v1660_v30 = vpop.f32.mrb[29].mxu1  ;;  %v1274_v34 = vsel %vm322_vm2, %v2003_v29, -inf }
 0x34a   : > { %v2005_v31 = vpop.f32.mrb[30].mxu1 }
 0x34b   : > { %v1277_v32 = vsel %vm322_vm2, %v2005_v31, -inf  ;;  %v1661_v33 = vpop.f32.mrb[31].mxu1 }
 0x34c   : > { %1278 = vmax.xlane.f32.xlu1 %v1277_v32 }
 0x358   : > { %481 = vrot.lane.b32.xlu0 %v1912_v20, %s1817_s30 }
 0x35d   : > { %617 = vrot.lane.b32.xlu1 %v1912_v20, %s1823_s13 }
 0x377   : > { %1275 = vmax.xlane.f32.xlu0 %v1274_v34 }
 0x3a7   : > { %v460_v35 = vpop.xlane.xlu0 %459 }
 0x3a8   : > { %v464_v36 = vsub.f32 %v451_v55, %v460_v35 }
 0x3a9   : > { %v463_v37 = vpop.xlane.xlu1 %462 }
 0x3aa   : > { %v466_v38 = vmul.f32 1.442695, %v464_v36  ;;  %v465_v39 = vsub.f32 %v454_v58, %v463_v37 }
 0x3ac   : > { %1720 = vpow2.f32 %v466_v38  ;;  %v468_v40 = vmul.f32 1.442695, %v465_v39 }
 0x3ae   : > { %1722 = vpow2.f32 %v468_v40 }
 0x3af   : > { %v596_v41 = vpop.xlane.xlu0 %595 }
 0x3b0   : > { %v600_v42 = vsub.f32 %v587_v61, %v596_v41 }
 0x3b2   : > { %v602_v43 = vmul.f32 1.442695, %v600_v42 }
 0x3b3   : > { %v599_v44 = vpop.xlane.xlu0 %598 }
 0x3b4   : > { %1724 = vpow2.f32 %v602_v43  ;;  %v601_v45 = vsub.f32 %v590_v1, %v599_v44 }
 0x3b6   : > { %v2015_v46 = vpop.eup %1720  ;;  %v604_v47 = vmul.f32 1.442695, %v601_v45 }
 0x3b7   : > { %v732_v48 = vpop.xlane.xlu0 %731  ;;  %v470_v49 = vsel %vm322_vm2, %v2015_v46, 0.0 }
 0x3b8   : > { %v2019_v50 = vpop.eup %1722  ;;  %1726 = vpow2.f32 %v604_v47  ;;  %v736_v51 = vsub.f32 %v1971_v4, %v732_v48  ;;  %471 = vadd.xlane.f32.xlu0 %v470_v49 }
 0x3b9   : > { %v735_v52 = vpop.xlane.xlu1 %734  ;;  %v473_v53 = vsel %vm322_vm2, %v2019_v50, 0.0 }
 0x3ba   : > { %v738_v54 = vmul.f32 1.442695, %v736_v51  ;;  %v737_v55 = vsub.f32 %v1975_v7, %v735_v52  ;;  %474 = vadd.xlane.f32.xlu1 %v473_v53 }
 0x3bc   : > { %1728 = vpow2.f32 %v738_v54  ;;  %v740_v56 = vmul.f32 1.442695, %v737_v55 }
 0x3be   : > { %v2025_v57 = vpop.eup %1724  ;;  %1730 = vpow2.f32 %v740_v56 }
 0x3bf   : > { %v606_v58 = vsel %vm322_vm2, %v2025_v57, 0.0  ;;  %v868_v62 = vpop.xlane.xlu0 %867 }
 0x3c0   : > { %607 = vadd.xlane.f32.xlu0 %v606_v58  ;;  %v872_v28 = vsub.f32 %v1979_v10, %v868_v62 }
 0x3c1   : > { %v871_v59 = vpop.xlane.xlu1 %870 }
 0x3c2   : > { %v2029_v60 = vpop.eup %1726  ;;  %v873_v61 = vsub.f32 %v1983_v13, %v871_v59  ;;  %v874_v30 = vmul.f32 1.442695, %v872_v28 }
 0x3c3   : > { %v609_v63 = vsel %vm322_vm2, %v2029_v60, 0.0 }
 0x3c4   : > { %v876_v1 = vmul.f32 1.442695, %v873_v61  ;;  %610 = vadd.xlane.f32.xlu1 %v609_v63 }
 0x3c6   : > { %v2034_v2 = vpop.eup %1728  ;;  %1732 = vpow2.f32 %v876_v1 }
 0x3c7   : > { %v1004_v3 = vpop.xlane.xlu0 %1003  ;;  %v742_v4 = vsel %vm322_vm2, %v2034_v2, 0.0 }
 0x3c8   : > { %v2038_v5 = vpop.eup %1730  ;;  %v1008_v6 = vsub.f32 %v1987_v16, %v1004_v3  ;;  %743 = vadd.xlane.f32.xlu0 %v742_v4 }
 0x3c9   : > { %v1007_v7 = vpop.xlane.xlu1 %1006  ;;  %v745_v8 = vsel %vm322_vm2, %v2038_v5, 0.0 }
 0x3ca   : > { %v1010_v9 = vmul.f32 1.442695, %v1008_v6  ;;  %v1009_v11 = vsub.f32 %v1991_v19, %v1007_v7  ;;  %746 = vadd.xlane.f32.xlu1 %v745_v8 }
 0x3cc   : > { %1734 = vpow2.f32 %v1010_v9  ;;  %v1012_v12 = vmul.f32 1.442695, %v1009_v11 }
 0x3ce   : > { %1736 = vpow2.f32 %v1012_v12 }
 0x3cf   : > { %v1140_v13 = vpop.xlane.xlu0 %1139 }
 0x3d0   : > { %v2044_v14 = vpop.eup %1732  ;;  %v1144_v32 = vsub.f32 %v1995_v23, %v1140_v13 }
 0x3d1   : > { %v1143_v15 = vpop.xlane.xlu1 %1142  ;;  %v881_v17 = vsel %vm322_vm2, %v2044_v14, 0.0 }
 0x3d2   : > { %v1145_v16 = vsub.f32 %v1999_v26, %v1143_v15  ;;  %882 = vadd.xlane.f32.xlu1 %v881_v17  ;;  %v1146_v33 = vmul.f32 1.442695, %v1144_v32 }
 0x3d3   : > { %v482_v18 = vpop.permute.xlu0 %481 }
 0x3d4   : > { %v1148_v21 = vmul.f32 1.442695, %v1145_v16  ;;  %1591 = vmatpush3.bf16.msra.mxu0 %v482_v18 }
 0x3d5   : > { %1602 = vmatprep.subr.bf16.mxu0 %v1815_v0 }
 0x3d6   : > { %v2050_v19 = vpop.eup %1734  ;;  %1738 = vpow2.f32 %v1148_v21 }
 0x3d7   : > { %v1014_v22 = vsel %vm322_vm2, %v2050_v19, 0.0  ;;  %1740 = vpow2.f32 %v874_v30 }
 0x3d8   : > { %v2054_v24 = vpop.eup %1736  ;;  %1015 = vadd.xlane.f32.xlu1 %v1014_v22  ;;  %1742 = vpow2.f32 %v1146_v33 }
 0x3d9   : > { %v1017_v25 = vsel %vm322_vm2, %v2054_v24, 0.0  ;;  %v1279_v37 = vpop.xlane.xlu1 %1278 }
 0x3da   : > { %v1281_v10 = vsub.f32 %v2005_v31, %v1279_v37 }
 0x3dc   : > { %1018 = vadd.xlane.f32.xlu1 %v1017_v25  ;;  %v1284_v40 = vmul.f32 1.442695, %v1281_v10 }
 0x3de   : > { %753 = vrot.lane.b32.xlu0 %v1912_v20, %s1818_s5 }
 0x3e0   : > { %v2060_v26 = vpop.eup %1738 }
 0x3e1   : > { %v1153_v27 = vsel %vm322_vm2, %v2060_v26, 0.0  ;;  %v2066_v34 = vpop.eup %1740 }
 0x3e2   : > { %1154 = vadd.xlane.f32.xlu1 %v1153_v27  ;;  %v878_v35 = vsel %vm322_vm2, %v2066_v34, 0.0  ;;  %v2070_v36 = vpop.eup %1742 }
 0x3e3   : > { %v1150_v38 = vsel %vm322_vm2, %v2070_v36, 0.0 }
 0x3fd   : > { %879 = vadd.xlane.f32.xlu0 %v878_v35 }
 0x401   : > { %1151 = vadd.xlane.f32.xlu0 %v1150_v38 }
 0x404   : > { %v1276_v39 = vpop.xlane.xlu0 %1275 }
 0x405   : > { %v1280_v23 = vsub.f32 %v2003_v29, %v1276_v39  ;;  %v618_v29 = vpop.permute.xlu1 %617 }
 0x407   : > { %v1282_v41 = vmul.f32 1.442695, %v1280_v23 }
 0x409   : > { %1744 = vpow2.f32 %v1282_v41 }
 0x40a   : > { %1746 = vpow2.f32 %v1284_v40 }
 0x413   : > { %v2076_v42 = vpop.eup %1744 }
 0x414   : > { %v1286_v43 = vsel %vm322_vm2, %v2076_v42, 0.0  ;;  %v2080_v44 = vpop.eup %1746 }
 0x415   : > { %1287 = vadd.xlane.f32.xlu1 %v1286_v43  ;;  %v1289_v31 = vsel %vm322_vm2, %v2080_v44, 0.0 }
 0x417   : > { %1025 = vrot.lane.b32.xlu0 %v1912_v20, %s1820_s7 }
 0x419   : > { %1290 = vadd.xlane.f32.xlu1 %v1289_v31 }
 0x41b   : > { %1161 = vrot.lane.b32.xlu0 %v1912_v20, %s1821_s8 }
 0x41f   : > { %1297 = vrot.lane.b32.xlu0 %v1912_v20, %s1822_s9 }
 0x42a   : > { %889 = vrot.lane.b32.xlu1 %v1912_v20, %s1819_s6 }
 0x445   : > { %v472_v45 = vpop.xlane.xlu0 %471 }
 0x446   : > { %1748 = vrcp.f32 %v472_v45 }
 0x447   : > { %v475_v47 = vpop.xlane.xlu1 %474 }
 0x448   : > { %1750 = vrcp.f32 %v475_v47 }
 0x44d   : > { %v608_v48 = vpop.xlane.xlu0 %607 }
 0x44e   : > { %1752 = vrcp.f32 %v608_v48 }
 0x450   : > { %v1749_v49 = vpop.eup %1748 }
 0x451   : > { %v611_v51 = vpop.xlane.xlu1 %610  ;;  %v478_v53 = vmul.f32 %v1749_v49, %v2015_v46 }
 0x452   : > { %v1751_v52 = vpop.eup %1750  ;;  %1754 = vrcp.f32 %v611_v51 }
 0x453   : > { %v479_v54 = vmul.f32 %v1751_v52, %v2019_v50 }
 0x455   : > { %v744_v55 = vpop.xlane.xlu0 %743  ;;  %v480_v56 = vpack.c.bf16 %v479_v54, %v478_v53 }
 0x456   : > { %1756 = vrcp.f32 %v744_v55 }
 0x457   : > { %v747_v58 = vpop.xlane.xlu1 %746  ;;  %1593 = vmatmul.mubr.msk.bf16.vlgmr.msra.gmra.mrb[4].mxu0 %vm322_vm2, %v480_v56 }
 0x458   : > { %1758 = vrcp.f32 %v747_v58  ;;  %1603 = vmatpush3.bf16.msra.mxu0 %v618_v29  ;;  %1604 = vmatprep.mubr.msk.bf16.mxu0 %vm1816_vm0, %v1815_v0  ;;  %v1753_v20 = vpop.eup %1752 }
 0x459   : > { %1614 = vmatprep.subr.bf16.mxu0 %v1815_v0  ;;  %v614_v61 = vmul.f32 %v1753_v20, %v2025_v57  ;;  %v754_v62 = vpop.permute.xlu0 %753 }
 0x45c   : > { %v1755_v59 = vpop.eup %1754 }
 0x45d   : > { %v615_v46 = vmul.f32 %v1755_v59, %v2029_v60 }
 0x45f   : > { %v616_v50 = vpack.c.bf16 %v615_v46, %v614_v61  ;;  %v883_v57 = vpop.xlane.xlu1 %882 }
 0x460   : > { %v1757_v63 = vpop.eup %1756 }
 0x461   : > { %1605 = vmatmul.mubr.msk.bf16.vlgmr.msra.gmra.mrb[8].mxu0 %vm322_vm2, %v616_v50  ;;  %v750_v4 = vmul.f32 %v1757_v63, %v2034_v2 }
 0x462   : > { %v1759_v1 = vpop.eup %1758  ;;  %1615 = vmatpush3.bf16.msra.mxu0 %v754_v62  ;;  %1616 = vmatprep.mubr.msk.bf16.mxu0 %vm1816_vm0, %v1815_v0 }
 0x463   : > { %v751_v3 = vmul.f32 %v1759_v1, %v2038_v5  ;;  %1626 = vmatprep.subr.bf16.mxu0 %v1815_v0 }
 0x465   : > { %v752_v6 = vpack.c.bf16 %v751_v3, %v750_v4  ;;  %v1016_v60 = vpop.xlane.xlu1 %1015 }
 0x469   : > { %1617 = vmatmul.mubr.msk.bf16.vlgmr.msra.gmra.mrb[12].mxu0 %vm322_vm2, %v752_v6  ;;  %v1019_v8 = vpop.xlane.xlu1 %1018 }
 0x46a   : > { %1628 = vmatprep.mubr.msk.bf16.mxu0 %vm1816_vm0, %v1815_v0 }
 0x46f   : > { %v1155_v9 = vpop.xlane.xlu1 %1154 }
 0x48a   : > { %v880_v7 = vpop.xlane.xlu0 %879 }
 0x48b   : > { %1760 = vrcp.f32 %v880_v7 }
 0x48c   : > { %1762 = vrcp.f32 %v883_v57 }
 0x48d   : > { %1764 = vrcp.f32 %v1019_v8 }
 0x48e   : > { %1766 = vrcp.f32 %v1016_v60  ;;  %v1152_v15 = vpop.xlane.xlu0 %1151 }
 0x48f   : > { %1768 = vrcp.f32 %v1152_v15 }
 0x490   : > { %1770 = vrcp.f32 %v1155_v9 }
 0x492   : > { %v1026_v21 = vpop.permute.xlu0 %1025 }
 0x495   : > { %v1761_v5 = vpop.eup %1760 }
 0x496   : > { %v1763_v13 = vpop.eup %1762  ;;  %v886_v2 = vmul.f32 %v1761_v5, %v2066_v34  ;;  %v1162_v30 = vpop.permute.xlu0 %1161 }
 0x497   : > { %v887_v17 = vmul.f32 %v1763_v13, %v2044_v14  ;;  %v1765_v22 = vpop.eup %1764 }
 0x498   : > { %v1767_v25 = vpop.eup %1766  ;;  %v1023_v27 = vmul.f32 %v1765_v22, %v2054_v24 }
 0x499   : > { %v888_v18 = vpack.c.bf16 %v887_v17, %v886_v2  ;;  %v1022_v14 = vmul.f32 %v1767_v25, %v2050_v19  ;;  %v1769_v32 = vpop.eup %1768 }
 0x49a   : > { %v1771_v33 = vpop.eup %1770  ;;  %v1158_v34 = vmul.f32 %v1769_v32, %v2070_v36  ;;  %v1298_v19 = vpop.permute.xlu0 %1297 }
 0x49b   : > { %v1024_v28 = vpack.c.bf16 %v1023_v27, %v1022_v14  ;;  %v1159_v24 = vmul.f32 %v1771_v33, %v2060_v26 }
 0x49d   : > { %v1160_v35 = vpack.c.bf16 %v1159_v24, %v1158_v34 }
 0x4a2   : > { %v1288_v11 = vpop.xlane.xlu1 %1287 }
 0x4a6   : > { %v1291_v12 = vpop.xlane.xlu1 %1290 }
 0x4a7   : > { %1772 = vrcp.f32 %v1291_v12 }
 0x4a8   : > { %1774 = vrcp.f32 %v1288_v11 }
 0x4aa   : > { %v890_v16 = vpop.permute.xlu1 %889 }
 0x4ab   : > { %1627 = vmatpush3.bf16.msra.mxu0 %v890_v16 }
 0x4ac   : > { %1638 = vmatprep.subr.bf16.mxu0 %v1815_v0 }
 0x4ae   : > { %1629 = vmatmul.mubr.msk.bf16.vlgmr.msra.gmra.mrb[16].mxu0 %vm322_vm2, %v888_v18 }
 0x4af   : > { %1639 = vmatpush3.bf16.msra.mxu0 %v1026_v21  ;;  %1640 = vmatprep.mubr.msk.bf16.mxu0 %vm1816_vm0, %v1815_v0 }
 0x4b0   : > { %1650 = vmatprep.subr.bf16.mxu0 %v1815_v0 }
 0x4b1   : > { %v1773_v37 = vpop.eup %1772 }
 0x4b2   : > { %v1775_v38 = vpop.eup %1774  ;;  %v1295_v10 = vmul.f32 %v1773_v37, %v2080_v44 }
 0x4b3   : > { %v1294_v39 = vmul.f32 %v1775_v38, %v2076_v42 }
 0x4b5   : > { %v1296_v23 = vpack.c.bf16 %v1295_v10, %v1294_v39 }
 0x4b6   : > { %1641 = vmatmul.mubr.msk.bf16.vlgmr.msra.gmra.mrb[20].mxu0 %vm322_vm2, %v1024_v28 }
 0x4b7   : > { %1651 = vmatpush3.bf16.msra.mxu0 %v1162_v30  ;;  %1652 = vmatprep.mubr.msk.bf16.mxu0 %vm1816_vm0, %v1815_v0 }
 0x4b8   : > { %1662 = vmatprep.subr.bf16.mxu0 %v1815_v0 }
 0x4be   : > { %1653 = vmatmul.mubr.msk.bf16.vlgmr.msra.gmra.mrb[24].mxu0 %vm322_vm2, %v1160_v35 }
 0x4bf   : > { %1663 = vmatpush3.bf16.msra.mxu0 %v1298_v19  ;;  %1664 = vmatprep.mubr.msk.bf16.mxu0 %vm1816_vm0, %v1815_v0 }
 0x4c6   : > { %1665 = vmatmul.mubr.msk.bf16.vlgmr.msra.gmra.mrb[28].mxu0 %vm322_vm2, %v1296_v23 }
 0x52a   : > { %v521_v36 = vpop.f32.mrb[4].mxu0 }
 0x52b   : > { %v1526_v40 = vpack.c.bf16 %v521_v36, %v521_v36  ;;  %v1594_v26 = vpop.f32.mrb[5].mxu0 }
 0x52c   : > { %v524_v41 = vpop.f32.mrb[6].mxu0 }
 0x52d   : > { %v1527_v43 = vpack.c.bf16 %v524_v41, %v524_v41  ;;  %534 = vrot.lane.b32.xlu1 %v1526_v40, %s1824_s17  ;;  %v1595_v31 = vpop.f32.mrb[7].mxu0 }
 0x52f   : > { %536 = vrot.lane.b32.xlu0 %v1527_v43, %s1824_s17 }
 0x534   : > { %v657_v29 = vpop.f32.mrb[8].mxu0 }
 0x535   : > { %v1528_v45 = vpack.c.bf16 %v657_v29, %v657_v29  ;;  %v1606_v47 = vpop.f32.mrb[9].mxu0 }
 0x536   : > { %v660_v0 = vpop.f32.mrb[10].mxu0 }
 0x537   : > { %v1529_v48 = vpack.c.bf16 %v660_v0, %v660_v0  ;;  %670 = vrot.lane.b32.xlu1 %v1528_v45, %s1825_s18  ;;  %v1607_v42 = vpop.f32.mrb[11].mxu0 }
 0x539   : > { %672 = vrot.lane.b32.xlu0 %v1529_v48, %s1825_s18 }
 0x53c   : > { %v793_v44 = vpop.f32.mrb[12].mxu0 }
 0x53d   : > { %v1530_v49 = vpack.c.bf16 %v793_v44, %v793_v44  ;;  %v1618_v51 = vpop.f32.mrb[13].mxu0 }
 0x53e   : > { %v796_v52 = vpop.f32.mrb[14].mxu0 }
 0x53f   : > { %v1531_v53 = vpack.c.bf16 %v796_v52, %v796_v52  ;;  %806 = vrot.lane.b32.xlu1 %v1530_v49, %s1826_s19  ;;  %v1619_v54 = vpop.f32.mrb[15].mxu0 }
 0x541   : > { %808 = vrot.lane.b32.xlu0 %v1531_v53, %s1826_s19 }
 0x581   : > { %v929_v55 = vpop.f32.mrb[16].mxu0 }
 0x582   : > { %v1532_v56 = vpack.c.bf16 %v929_v55, %v929_v55  ;;  %v1630_v58 = vpop.f32.mrb[17].mxu0 }
 0x583   : > { %v932_v20 = vpop.f32.mrb[18].mxu0 }
 0x584   : > { %v1533_v59 = vpack.c.bf16 %v932_v20, %v932_v20  ;;  %942 = vrot.lane.b32.xlu1 %v1532_v56, %s1827_s20  ;;  %v1631_v61 = vpop.f32.mrb[19].mxu0 }
 0x586   : > { %944 = vrot.lane.b32.xlu0 %v1533_v59, %s1827_s20 }
 0x589   : > { %v1065_v46 = vpop.f32.mrb[20].mxu0 }
 0x58a   : > { %v1534_v50 = vpack.c.bf16 %v1065_v46, %v1065_v46  ;;  %v1642_v62 = vpop.f32.mrb[21].mxu0 }
 0x58b   : > { %v1068_v63 = vpop.f32.mrb[22].mxu0 }
 0x58c   : > { %v1535_v1 = vpack.c.bf16 %v1068_v63, %v1068_v63  ;;  %1078 = vrot.lane.b32.xlu1 %v1534_v50, %s1828_s23  ;;  %v1643_v3 = vpop.f32.mrb[23].mxu0 }
 0x58e   : > { %1080 = vrot.lane.b32.xlu0 %v1535_v1, %s1828_s23 }
 0x591   : > { %v1201_v4 = vpop.f32.mrb[24].mxu0 }
 0x592   : > { %v1536_v6 = vpack.c.bf16 %v1201_v4, %v1201_v4  ;;  %v1654_v57 = vpop.f32.mrb[25].mxu0 }
 0x593   : > { %v1204_v60 = vpop.f32.mrb[26].mxu0 }
 0x594   : > { %v1537_v7 = vpack.c.bf16 %v1204_v60, %v1204_v60  ;;  %1214 = vrot.lane.b32.xlu1 %v1536_v6, %s1829_s24  ;;  %v1655_v8 = vpop.f32.mrb[27].mxu0 }
 0x596   : > { %1216 = vrot.lane.b32.xlu0 %v1537_v7, %s1829_s24 }
 0x599   : > { %v1337_v9 = vpop.f32.mrb[28].mxu0 }
 0x59a   : > { %v1538_v11 = vpack.c.bf16 %v1337_v9, %v1337_v9  ;;  %v1666_v5 = vpop.f32.mrb[29].mxu0 }
 0x59b   : > { %v1340_v12 = vpop.f32.mrb[30].mxu0 }
 0x59c   : > { %v1539_v13 = vpack.c.bf16 %v1340_v12, %v1340_v12  ;;  %1350 = vrot.lane.b32.xlu1 %v1538_v11, %s1830_s25  ;;  %v1667_v2 = vpop.f32.mrb[31].mxu0 }
 0x59e   : > { %1352 = vrot.lane.b32.xlu0 %v1539_v13, %s1830_s25 }
 0x59f   : > { %v535_v15 = vpop.permute.xlu1 %534 }
 0x5a0   : > { %541 = vst.msk [vmem:[%s1963_s16] sm:$0xf] %vm540_vm4, %v535_v15 }
 0x5a1   : > { %v537_v17 = vpop.permute.xlu0 %536 }
 0x5a2   : > { %542 = vst.msk [vmem:[%s1963_s16 + $0x4] sm:$0xf] %vm540_vm4, %v537_v17 }
 0x5a9   : > { %v671_v16 = vpop.permute.xlu1 %670 }
 0x5aa   : > { %677 = vst.msk [vmem:[%s1963_s16] sm:$0xf] %vm676_vm5, %v671_v16 }
 0x5ab   : > { %v673_v18 = vpop.permute.xlu0 %672 }
 0x5ac   : > { %678 = vst.msk [vmem:[%s1963_s16 + $0x4] sm:$0xf] %vm676_vm5, %v673_v18 }
 0x5b1   : > { %v807_v21 = vpop.permute.xlu1 %806 }
 0x5b2   : > { %813 = vst.msk [vmem:[%s1963_s16] sm:$0xf] %vm812_vm6, %v807_v21 }
 0x5b3   : > { %v809_v22 = vpop.permute.xlu0 %808 }
 0x5b4   : > { %814 = vst.msk [vmem:[%s1963_s16 + $0x4] sm:$0xf] %vm812_vm6, %v809_v22 }
 0x5f6   : > { %v943_v25 = vpop.permute.xlu1 %942 }
 0x5f7   : > { %949 = vst.msk [vmem:[%s1963_s16] sm:$0xf] %vm948_vm7, %v943_v25 }
 0x5f8   : > { %v945_v27 = vpop.permute.xlu0 %944 }
 0x5f9   : > { %950 = vst.msk [vmem:[%s1963_s16 + $0x4] sm:$0xf] %vm948_vm7, %v945_v27 }
 0x5fe   : > { %v1079_v14 = vpop.permute.xlu1 %1078 }
 0x5ff   : > { %1085 = vst.msk [vmem:[%s1963_s16] sm:$0xf] %vm1084_vm8, %v1079_v14 }
 0x600   : > { %v1081_v28 = vpop.permute.xlu0 %1080 }
 0x601   : > { %1086 = vst.msk [vmem:[%s1963_s16 + $0x4] sm:$0xf] %vm1084_vm8, %v1081_v28 }
 0x606   : > { %v1215_v30 = vpop.permute.xlu1 %1214 }
 0x607   : > { %1221 = vst.msk [vmem:[%s1963_s16] sm:$0xf] %vm1220_vm9, %v1215_v30 }
 0x608   : > { %v1217_v32 = vpop.permute.xlu0 %1216 }
 0x609   : > { %1222 = vst.msk [vmem:[%s1963_s16 + $0x4] sm:$0xf] %vm1220_vm9, %v1217_v32 }
 0x60e   : > { %v1351_v33 = vpop.permute.xlu1 %1350 }
 0x60f   : > { %1357 = vst.msk [vmem:[%s1963_s16] sm:$0xf] %vm1356_vm10, %v1351_v33 }
 0x610   : > { %v1353_v34 = vpop.permute.xlu0 %1352 }
 0x611   : > { %1358 = vst.msk [vmem:[%s1963_s16 + $0x4] sm:$0xf] %vm1356_vm10, %v1353_v34 }
 0x612 PF: > { %s20_s22 = sadd.s32 1, %s1812_s22   ;;  %s2158_s20 = smov %s1808_s21 }
 0x613   : > { %p17_p10 = scmp.ge.s32.totalorder %s20_s22, 4   ;;  %s2159_s21 = smov %s2161_s0 }
 0x615   :  { %19 = sbr.rel (!%p17_p10) target bundleno = 17 (0x11), region = 68 }

// kernel: cformer_stage1.17
= control target key start
LH: loop header
LB: loop body
LE: loop exit
PB: predicated region body
PF: predicated region fallthrough
CT: control target
= control target key end

     0   :  { %vm22_vm0 = vcmask 261120   ;;  %v248_v1 = vmov 0.0   ;;  %vm77_vm1 = vcmask 523264   ;;  %vm188_vm2 = vcmask 257024   ;;  %s321_s1 = inlined_call_operand.vmem [shape: bf16[64,32], index: 1, kind: input, shape index: {}]   ;;  %s322_s0 = inlined_call_operand.vmem [shape: bf16[32,64], index: 0, kind: input, shape index: {}]   ;;  %s323_s3 = inlined_call_operand.vmem [shape: bf16[32,32], index: 3, kind: input, shape index: {}]   ;;  %s324_s2 = inlined_call_operand.vmem [shape: f32[1,32], index: 2, kind: input, shape index: {}]   ;;  %s325_s4 = inlined_call_operand.vmem [shape: bf16[32,32], index: 4, kind: output, shape index: {}]  }
   0x1   :  { %v242_v0 = vld [vmem:[%s321_s1] sm:$0xff]   ;;  %25 = vst.msk [vmem:[#allocation2 + $0x10] sm:$0xff] %vm22_vm0, %v248_v1  ;;  %23 = vst.msk [vmem:[#allocation2] sm:$0xff] %vm22_vm0, %v248_v1  ;;  %v243_v2 = vld [vmem:[%s321_s1 + $0x8] sm:$0xff]  }
   0x2   :  { %24 = vst.msk [vmem:[#allocation2 + $0x8] sm:$0xff] %vm22_vm0, %v248_v1  ;;  %26 = vst.msk [vmem:[#allocation2 + $0x18] sm:$0xff] %vm22_vm0, %v248_v1  ;;  %229 = vmatprep.subr.bf16.mxu0 %v242_v0  ;;  %v244_v3 = vld [vmem:[%s321_s1 + $0x10] sm:$0xff]   ;;  %v246_v4 = vld [vmem:[%s322_s0] sm:$0xff]  }
   0x3   :  { %230 = vmatpush3.bf16.msra.mxu0 %v242_v0  ;;  %237 = vmatprep.mubr.msk.bf16.mxu0 %vm77_vm1, %v246_v4  ;;  %v245_v5 = vld [vmem:[%s321_s1 + $0x18] sm:$0xff]   ;;  %v247_v6 = vld [vmem:[%s322_s0 + $0x8] sm:$0xff]   ;;  %v215_v20 = vld [vmem:[%s323_s3] sm:$0xff]  }
   0x4   :  { %231 = vmatprep.subr.bf16.mxu0 %v243_v2  ;;  %v222_v19 = vld [vmem:[%s323_s3 + $0x8] sm:$0xff]   ;;  %v205_v21 = vld [vmem:[%s324_s2] ss:$0 sm:$0xff]  ;;  %v216_v24 = vunpack.c.l.bf16 %v215_v20  ;;  %v217_v30 = vunpack.c.h.bf16 %v215_v20 }
   0x5   :  { %v220_v22 = vunpack.c.l.bf16 %v222_v19  ;;  %v221_v27 = vunpack.c.h.bf16 %v222_v19 }
   0x7   :  { %232 = vmatpush3.bf16.msra.mxu0 %v243_v2 }
   0x8   :  { %233 = vmatprep.subr.bf16.mxu0 %v244_v3  ;;  %v29_v7 = vld [vmem:[#allocation2 + $0x10] sm:$0xff]  ;;  %v27_v8 = vld [vmem:[#allocation2] sm:$0xff] }
   0x9   :  { %v30_v10 = vld [vmem:[#allocation2 + $0x18] sm:$0xff]  ;;  %v28_v13 = vld [vmem:[#allocation2 + $0x8] sm:$0xff] }
   0xb   :  { %234 = vmatpush3.bf16.msra.mxu0 %v244_v3 }
   0xc   :  { %235 = vmatprep.subr.bf16.mxu0 %v245_v5 }
   0xf   :  { %236 = vmatpush3.bf16.msra.mxu0 %v245_v5 }
  0x12   :  { %238 = vmatmul.mubr.msk.bf16.vlgmr.msra.gmra.mrb[0].mxu0 %vm77_vm1, %v247_v6 }
  0xe5   :  { %v239_v9 = vpop.f32.mrb[0].mxu0 }
  0xe6   :  { %v135_v11 = vadd.f32 %v239_v9, %v29_v7  ;;  %v118_v12 = vpop.f32.mrb[1].mxu0 }
  0xe7   :  { %v133_v14 = vadd.f32 %v118_v12, %v27_v8  ;;  %v240_v15 = vpop.f32.mrb[2].mxu0 }
  0xe8   :  { %140 = vst.msk [vmem:[#allocation2 + $0x10] sm:$0xff] %vm22_vm0, %v135_v11  ;;  %v136_v16 = vadd.f32 %v240_v15, %v30_v10  ;;  %v121_v17 = vpop.f32.mrb[3].mxu0 }
  0xe9   :  { %138 = vst.msk [vmem:[#allocation2] sm:$0xff] %vm22_vm0, %v133_v14  ;;  %v134_v18 = vadd.f32 %v121_v17, %v28_v13 }
  0xea   :  { %141 = vst.msk [vmem:[#allocation2 + $0x18] sm:$0xff] %vm22_vm0, %v136_v16 }
  0xeb   :  { %139 = vst.msk [vmem:[#allocation2 + $0x8] sm:$0xff] %vm22_vm0, %v134_v18 }
  0xef   :  { %v147_v23 = vld [vmem:[#allocation2 + $0x10] sm:$0xff] }
  0xf0   :  { %v158_v25 = vadd.f32 %v205_v21, %v147_v23  ;;  %v145_v26 = vld [vmem:[#allocation2] sm:$0xff] }
  0xf1   :  { %v156_v28 = vadd.f32 %v205_v21, %v145_v26  ;;  %v148_v29 = vld [vmem:[#allocation2 + $0x18] sm:$0xff] }
  0xf2   :  { %v170_v31 = vadd.f32 %v220_v22, %v158_v25  ;;  %v159_v32 = vadd.f32 %v205_v21, %v148_v29  ;;  %v146_v33 = vld [vmem:[#allocation2 + $0x8] sm:$0xff] }
  0xf3   :  { %v168_v34 = vadd.f32 %v216_v24, %v156_v28  ;;  %v157_v35 = vadd.f32 %v205_v21, %v146_v33 }
  0xf4   :  { %v212_v36 = vpack.c.bf16 %v170_v31, %v170_v31  ;;  %v171_v37 = vadd.f32 %v221_v27, %v159_v32 }
  0xf5   :  { %v210_v38 = vpack.c.bf16 %v168_v34, %v168_v34  ;;  %v169_v39 = vadd.f32 %v217_v30, %v157_v35 }
  0xf6   :  { %191 = vst.msk [vmem:[%s325_s4 + $0x8] sm:$0xf] %vm188_vm2, %v212_v36  ;;  %v213_v40 = vpack.c.bf16 %v171_v37, %v171_v37 }
  0xf7   :  { %189 = vst.msk [vmem:[%s325_s4] sm:$0xf] %vm188_vm2, %v210_v38  ;;  %v211_v41 = vpack.c.bf16 %v169_v39, %v169_v39 }
  0xf8   :  { %192 = vst.msk [vmem:[%s325_s4 + $0xc] sm:$0xf] %vm188_vm2, %v213_v40 }
  0xf9   :  { %190 = vst.msk [vmem:[%s325_s4 + $0x4] sm:$0xf] %vm188_vm2, %v211_v41 }

</bundles_post_ra>
